<compile_context>
chip_gen: v7x
topology: tpu7x:2x2x1
jax: 0.10.0
libtpu: 0.0.40
codegen_flags: <defaults>
</compile_context>

<pallas_src>
import jax
import jax.numpy as jnp
from jax.experimental import pallas as pl
from jax.experimental.pallas import tpu as pltpu


# ------------------------------ Pallas kernel ----------------------------------

def _make_kernel(C, Cr, W2, HW2):
    """Build the EN_Block kernel body for static sizes (C, C//red, W2, H2*W2)."""

    def kernel(x_ref, wd_ref, w1a_ref, w2a_ref, ca1a_ref, ca2a_ref,
               w1b_ref, w2b_ref, ca1b_ref, ca2b_ref, o_ref):
        # Lane-index masks for the shifted-tap conv (built once, reused by all 4 convs).
        col_c = jax.lax.broadcasted_iota(jnp.int32, (C, HW2), 1)
        col_3c = jax.lax.broadcasted_iota(jnp.int32, (3 * C, HW2), 1)
        m_wl = (col_c % W2) > 0             # x[h, w-1] exists
        m_wr = (col_c % W2) < (W2 - 1)      # x[h, w+1] exists
        m_hu = col_3c >= W2                 # x[h-1, w] exists
        m_hd = col_3c < (HW2 - W2)          # x[h+1, w] exists

        def conv3x3(act, w_ref):
            """3x3 'same' conv in the (C, H2*W2) layout: rolled im2col + one bf16 dot.

            Shifts run on the XLU (pltpu.roll, non-negative static shifts), boundary
            zeroing on the VPU, and the single (C, 9C) @ (9C, HW2) matmul on the MXU
            with f32 accumulation.  No halo scratch, no banded weight matrices.
            """
            zc = jnp.zeros_like(act)
            a_l = jnp.where(m_wl, pltpu.roll(act, 1, axis=1), zc)         # x[h, w-1]
            a_r = jnp.where(m_wr, pltpu.roll(act, HW2 - 1, axis=1), zc)   # x[h, w+1]
            p0 = jnp.concatenate([a_l, act, a_r], axis=0)                 # (3C, HW2), dh=0
            z3 = jnp.zeros_like(p0)
            p_u = jnp.where(m_hu, pltpu.roll(p0, W2, axis=1), z3)         # x[h-1, .]
            p_d = jnp.where(m_hd, pltpu.roll(p0, HW2 - W2, axis=1), z3)   # x[h+1, .]
            patch = jnp.concatenate([p_u, p0, p_d], axis=0)               # (9C, HW2) f32
            return jnp.dot(w_ref[...], patch.astype(jnp.bfloat16),
                           preferred_element_type=jnp.float32)            # (C, HW2) f32

        def cab(act, w1_ref, w2_ref, ca1_ref, ca2_ref):
            """CAB: conv3x3 -> ReLU -> conv3x3 -> channel attention -> + residual."""
            res = jnp.maximum(conv3x3(act, w1_ref), 0.0)
            res = conv3x3(res, w2_ref)
            # Channel attention.  Spatial mean: XLU lane reduce (1/(H2*W2) folded into
            # ca1 host-side); squeeze: one tiny f32 dot; excite: VPU broadcast MAC.
            ssum = jnp.sum(res, axis=1, keepdims=True)                    # (C, 1) f32
            z = jnp.maximum(jnp.dot(ca1_ref[...], ssum,
                                    preferred_element_type=jnp.float32), 0.0)  # (Cr, 1)
            gate = jnp.zeros((C, 1), jnp.float32)
            for d in range(Cr):                                           # Cr = C//red (=2)
                gate = gate + ca2_ref[:, d:d + 1] * z[d:d + 1, :]
            gate = jax.nn.sigmoid(gate)
            return res * gate + act

        # DownSample: 2x2 avg pool (3 VPU adds over the 4 pre-gathered taps) + 1x1 conv.
        pool = 0.25 * (x_ref[0] + x_ref[1] + x_ref[2] + x_ref[3])         # (Cin, HW2) f32
        h = jnp.dot(wd_ref[...], pool.astype(jnp.bfloat16),
                    preferred_element_type=jnp.float32)                   # (C, HW2) f32

        h = cab(h, w1a_ref, w2a_ref, ca1a_ref, ca2a_ref)
        h = cab(h, w1b_ref, w2b_ref, ca1b_ref, ca2b_ref)
        o_ref[...] = h

    return kernel


# --------------------------- host-side weight prep ------------------------------

def _fold_weights(params, H2, W2):
    """Pre-transpose weights for the (C, H2*W2) layout; big matmul weights -> bf16."""
    C = params["w_down"].shape[-1]
    ws = [jnp.asarray(params["w_down"]).T.astype(jnp.bfloat16)]            # (C, Cin)
    for i in (0, 1):
        for name in (f"w1_{i}", f"w2_{i}"):
            wt = jnp.asarray(params[name])                                 # (9, C, C), t = kh*3+kw
            ws.append(jnp.transpose(wt, (2, 0, 1)).reshape(C, -1)
                      .astype(jnp.bfloat16))                               # (C, 9C)
        ws.append((jnp.asarray(params[f"wca1_{i}"]).T / float(H2 * W2))
                  .astype(jnp.float32))                                    # (C//red, C), mean folded
        ws.append(jnp.asarray(params[f"wca2_{i}"]).T.astype(jnp.float32))  # (C, C//red)
    return ws


# ------------------------------ wrapper ------------------------------------------

def en_block(x_nchw, params, *, buffered_weights=True):
    N, Cin, H, W = x_nchw.shape
    assert H % 2 == 0 and W % 2 == 0, "EN_Block downsample assumes even H, W"
    C = params["w_down"].shape[-1]
    Cr = params["wca1_0"].shape[-1]
    H2, W2 = H // 2, W // 2
    HW2 = H2 * W2

    weights = _fold_weights(params, H2, W2)

    # Host-side layout plumbing (pure reshape/transpose): gather the four 2x2-pool taps
    # onto a leading axis -> (N, 4, Cin, H2*W2); spatial stays lane-dense in the kernel.
    xp = x_nchw.reshape(N, Cin, H2, 2, W2, 2)
    xp = jnp.transpose(xp, (0, 3, 5, 1, 2, 4)).reshape(N, 4, Cin, HW2)

    def wspec(a):
        if buffered_weights:
            # Constant blocks (index_map always 0): single-buffer to halve weight VMEM.
            return pl.BlockSpec(a.shape, lambda n, _nd=a.ndim: (0,) * _nd,
                                pipeline_mode=pl.Buffered(1))
        return pl.BlockSpec(a.shape, lambda n, _nd=a.ndim: (0,) * _nd)

    in_specs = [pl.BlockSpec((pl.Squeezed(), 4, Cin, HW2), lambda n: (n, 0, 0, 0))]
    in_specs += [wspec(w) for w in weights]

    out = pl.pallas_call(
        _make_kernel(C, Cr, W2, HW2),
        out_shape=jax.ShapeDtypeStruct((N, C, HW2), jnp.float32),
        grid_spec=pltpu.PrefetchScalarGridSpec(
            num_scalar_prefetch=0,
            grid=(N,),                                   # one image / step; "parallel"
            in_specs=in_specs,                           # keeps both v7x TCs busy at N>=2
            out_specs=pl.BlockSpec((pl.Squeezed(), C, HW2), lambda n: (n, 0, 0)),
        ),
        compiler_params=pltpu.CompilerParams(
            dimension_semantics=("parallel",),
            vmem_limit_bytes=32 * 1024 * 1024),
    )(xp, *weights)

    return out.reshape(N, C, H2, W2)                     # NCHW, matching PyTorch


# --------------------------- pure-JAX reference ----------------------------------

def _conv3x3_ref(x_nhwc, w_taps):
    C_in, C_out = w_taps.shape[1], w_taps.shape[2]
    w = w_taps.reshape(3, 3, C_in, C_out)
    return jax.lax.conv_general_dilated(
        x_nhwc, w, window_strides=(1, 1), padding="SAME",
        dimension_numbers=("NHWC", "HWIO", "NHWC"))


def _cab_ref(x, w1, w2, wca1, wca2):
    res = jax.nn.relu(_conv3x3_ref(x, w1))
    res = _conv3x3_ref(res, w2)
    y = jnp.mean(res, axis=(1, 2), keepdims=True)
    z = jax.nn.relu(jnp.einsum("nijc,cd->nijd", y, wca1))
    z = jax.nn.sigmoid(jnp.einsum("nijc,cd->nijd", z, wca2))
    return res * z + x


def en_block_ref(x_nchw, p):
    x = jnp.transpose(x_nchw, (0, 2, 3, 1))              # NHWC
    pool = 0.25 * (x[:, 0::2, 0::2] + x[:, 0::2, 1::2]
                   + x[:, 1::2, 0::2] + x[:, 1::2, 1::2])
    h = jnp.einsum("nhwc,cd->nhwd", pool, p["w_down"])
    h = _cab_ref(h, p["w1_0"], p["w2_0"], p["wca1_0"], p["wca2_0"])
    h = _cab_ref(h, p["w1_1"], p["w2_1"], p["wca1_1"], p["wca2_1"])
    return jnp.transpose(h, (0, 3, 1, 2))                # back to NCHW


# ------------------------------- main ---------------------------------------------

if __name__ == "__main__":
    key = jax.random.PRNGKey(0)
    N, Cin, H, W = 2, 4, 16, 16          # in_planes=4
    C, red = 8, 4                        # planes=8, reduction=4 -> squeeze channels = 2
    keys = jax.random.split(key, 10)

    x = jax.random.normal(keys[0], (N, Cin, H, W), jnp.float32)   # PyTorch NCHW layout

    def nrm(k, shape, scale=0.1):
        return scale * jax.random.normal(k, shape, jnp.float32)

    params = {
        "w_down": nrm(keys[1], (Cin, C)),          # DownSample 1x1 conv (bias=False)
        "w1_0":   nrm(keys[2], (9, C, C)),         # CAB#0 conv3x3 #1 (tap t = kh*3 + kw)
        "w2_0":   nrm(keys[3], (9, C, C)),         # CAB#0 conv3x3 #2
        "wca1_0": nrm(keys[4], (C, C // red)),     # CAB#0 CA squeeze 1x1
        "wca2_0": nrm(keys[5], (C // red, C)),     # CAB#0 CA excite 1x1
        "w1_1":   nrm(keys[6], (9, C, C)),
        "w2_1":   nrm(keys[7], (9, C, C)),
        "wca1_1": nrm(keys[8], (C, C // red)),
        "wca2_1": nrm(keys[9], (C // red, C)),
    }

    ref = en_block_ref(x, params)

    def run(buffered):
        out = jax.block_until_ready(en_block(x, params, buffered_weights=buffered))
        assert out.shape == (N, C, H // 2, W // 2)
        # bf16 MXU operands -> looser tolerance than the old pure-f32 kernel.
        assert jnp.allclose(out, ref, atol=2e-2, rtol=2e-2), \
            "Pallas output mismatch vs reference"
        return out

    try:
        run(True)                          # single-buffered constant weights (v7x VMEM)
    except Exception:
        run(False)                         # fallback if this build rejects pl.Buffered(1)

    print("KERNEL_OK")
</pallas_src>

<mosaic_0001>
module attributes {stable_mosaic.version = 11 : i64} {
  func.func @kernel(%arg0: i32, %arg1: memref<1x4x4x64xf32, #tpu.memory_space<vmem>>, %arg2: memref<8x4xbf16, #tpu.memory_space<vmem>>, %arg3: memref<8x72xbf16, #tpu.memory_space<vmem>>, %arg4: memref<8x72xbf16, #tpu.memory_space<vmem>>, %arg5: memref<2x8xf32, #tpu.memory_space<vmem>>, %arg6: memref<8x2xf32, #tpu.memory_space<vmem>>, %arg7: memref<8x72xbf16, #tpu.memory_space<vmem>>, %arg8: memref<8x72xbf16, #tpu.memory_space<vmem>>, %arg9: memref<2x8xf32, #tpu.memory_space<vmem>>, %arg10: memref<8x2xf32, #tpu.memory_space<vmem>>, %arg11: memref<1x8x64xf32, #tpu.memory_space<vmem>>) attributes {dimension_semantics = [#tpu.dimension_semantics<parallel>], iteration_bounds = array<i64: 2>, scalar_prefetch = 0 : i64, scratch_operands = 0 : i64, tpu.core_type = #tpu.core_type<tc>, window_params = [{transform_indices = @transform_0, window_bounds = array<i64: 1, 4, 4, 64>}, {pipeline_mode = #tpu.pipeline_mode<synchronous>, transform_indices = @transform_1, window_bounds = array<i64: 8, 4>}, {pipeline_mode = #tpu.pipeline_mode<synchronous>, transform_indices = @transform_2, window_bounds = array<i64: 8, 72>}, {pipeline_mode = #tpu.pipeline_mode<synchronous>, transform_indices = @transform_3, window_bounds = array<i64: 8, 72>}, {pipeline_mode = #tpu.pipeline_mode<synchronous>, transform_indices = @transform_4, window_bounds = array<i64: 2, 8>}, {pipeline_mode = #tpu.pipeline_mode<synchronous>, transform_indices = @transform_5, window_bounds = array<i64: 8, 2>}, {pipeline_mode = #tpu.pipeline_mode<synchronous>, transform_indices = @transform_6, window_bounds = array<i64: 8, 72>}, {pipeline_mode = #tpu.pipeline_mode<synchronous>, transform_indices = @transform_7, window_bounds = array<i64: 8, 72>}, {pipeline_mode = #tpu.pipeline_mode<synchronous>, transform_indices = @transform_8, window_bounds = array<i64: 2, 8>}, {pipeline_mode = #tpu.pipeline_mode<synchronous>, transform_indices = @transform_9, window_bounds = array<i64: 8, 2>}, {transform_indices = @transform_10, window_bounds = array<i64: 1, 8, 64>}]} {
    %0 = tpu.iota {dimensions = array<i32: 1>} : vector<8x64xi32>
    %1 = tpu.iota {dimensions = array<i32: 1>} : vector<24x64xi32>
    %c8_i32 = arith.constant 8 : i32
    %c0_i32 = arith.constant 0 : i32
    %2 = arith.cmpi eq, %c8_i32, %c0_i32 : i32
    %c1_i32 = arith.constant 1 : i32
    %3 = arith.select %2, %c1_i32, %c8_i32 : i32
    %4 = vector.broadcast %3 : i32 to vector<8x64xi32>
    %5 = arith.remsi %0, %4 : vector<8x64xi32>
    %c0_i32_0 = arith.constant 0 : i32
    %6 = vector.broadcast %c0_i32_0 : i32 to vector<8x64xi32>
    %7 = arith.cmpi ne, %5, %6 : vector<8x64xi32>
    %c0_i32_1 = arith.constant 0 : i32
    %8 = vector.broadcast %c0_i32_1 : i32 to vector<8x64xi32>
    %9 = arith.cmpi slt, %5, %8 : vector<8x64xi32>
    %c0_i32_2 = arith.constant 0 : i32
    %10 = arith.cmpi slt, %3, %c0_i32_2 : i32
    %11 = vector.broadcast %10 : i1 to vector<8x64xi1>
    %12 = vector.broadcast %11 : vector<8x64xi1> to vector<8x64xi1>
    %13 = arith.xori %9, %12 : vector<8x64xi1>
    %14 = arith.andi %13, %7 : vector<8x64xi1>
    %15 = vector.broadcast %3 : i32 to vector<8x64xi32>
    %16 = arith.addi %5, %15 : vector<8x64xi32>
    %17 = arith.select %14, %16, %5 : vector<8x64xi1>, vector<8x64xi32>
    %c0_i32_3 = arith.constant 0 : i32
    %18 = vector.broadcast %c0_i32_3 : i32 to vector<8x64xi32>
    %19 = arith.cmpi sgt, %17, %18 : vector<8x64xi32>
    %c8_i32_4 = arith.constant 8 : i32
    %c0_i32_5 = arith.constant 0 : i32
    %20 = arith.cmpi eq, %c8_i32_4, %c0_i32_5 : i32
    %c1_i32_6 = arith.constant 1 : i32
    %21 = arith.select %20, %c1_i32_6, %c8_i32_4 : i32
    %22 = vector.broadcast %21 : i32 to vector<8x64xi32>
    %23 = arith.remsi %0, %22 : vector<8x64xi32>
    %c0_i32_7 = arith.constant 0 : i32
    %24 = vector.broadcast %c0_i32_7 : i32 to vector<8x64xi32>
    %25 = arith.cmpi ne, %23, %24 : vector<8x64xi32>
    %c0_i32_8 = arith.constant 0 : i32
    %26 = vector.broadcast %c0_i32_8 : i32 to vector<8x64xi32>
    %27 = arith.cmpi slt, %23, %26 : vector<8x64xi32>
    %c0_i32_9 = arith.constant 0 : i32
    %28 = arith.cmpi slt, %21, %c0_i32_9 : i32
    %29 = vector.broadcast %28 : i1 to vector<8x64xi1>
    %30 = vector.broadcast %29 : vector<8x64xi1> to vector<8x64xi1>
    %31 = arith.xori %27, %30 : vector<8x64xi1>
    %32 = arith.andi %31, %25 : vector<8x64xi1>
    %33 = vector.broadcast %21 : i32 to vector<8x64xi32>
    %34 = arith.addi %23, %33 : vector<8x64xi32>
    %35 = arith.select %32, %34, %23 : vector<8x64xi1>, vector<8x64xi32>
    %c7_i32 = arith.constant 7 : i32
    %36 = vector.broadcast %c7_i32 : i32 to vector<8x64xi32>
    %37 = arith.cmpi slt, %35, %36 : vector<8x64xi32>
    %c8_i32_10 = arith.constant 8 : i32
    %38 = vector.broadcast %c8_i32_10 : i32 to vector<24x64xi32>
    %39 = arith.cmpi sge, %1, %38 : vector<24x64xi32>
    %c56_i32 = arith.constant 56 : i32
    %40 = vector.broadcast %c56_i32 : i32 to vector<24x64xi32>
    %41 = arith.cmpi slt, %1, %40 : vector<24x64xi32>
    %c0 = arith.constant 0 : index
    %c0_11 = arith.constant 0 : index
    %c0_12 = arith.constant 0 : index
    %c0_13 = arith.constant 0 : index
    %42 = vector.load %arg1[%c0, %c0_11, %c0_12, %c0_13] : memref<1x4x4x64xf32, #tpu.memory_space<vmem>>, vector<1x1x4x64xf32>
    %43 = vector.shape_cast %42 : vector<1x1x4x64xf32> to vector<4x64xf32>
    %c0_14 = arith.constant 0 : index
    %c1 = arith.constant 1 : index
    %c0_15 = arith.constant 0 : index
    %c0_16 = arith.constant 0 : index
    %44 = vector.load %arg1[%c0_14, %c1, %c0_15, %c0_16] : memref<1x4x4x64xf32, #tpu.memory_space<vmem>>, vector<1x1x4x64xf32>
    %45 = vector.shape_cast %44 : vector<1x1x4x64xf32> to vector<4x64xf32>
    %46 = arith.addf %43, %45 : vector<4x64xf32>
    %c0_17 = arith.constant 0 : index
    %c2 = arith.constant 2 : index
    %c0_18 = arith.constant 0 : index
    %c0_19 = arith.constant 0 : index
    %47 = vector.load %arg1[%c0_17, %c2, %c0_18, %c0_19] : memref<1x4x4x64xf32, #tpu.memory_space<vmem>>, vector<1x1x4x64xf32>
    %48 = vector.shape_cast %47 : vector<1x1x4x64xf32> to vector<4x64xf32>
    %49 = arith.addf %46, %48 : vector<4x64xf32>
    %c0_20 = arith.constant 0 : index
    %c3 = arith.constant 3 : index
    %c0_21 = arith.constant 0 : index
    %c0_22 = arith.constant 0 : index
    %50 = vector.load %arg1[%c0_20, %c3, %c0_21, %c0_22] : memref<1x4x4x64xf32, #tpu.memory_space<vmem>>, vector<1x1x4x64xf32>
    %51 = vector.shape_cast %50 : vector<1x1x4x64xf32> to vector<4x64xf32>
    %52 = arith.addf %49, %51 : vector<4x64xf32>
    %cst = arith.constant 2.500000e-01 : f32
    %53 = vector.broadcast %cst : f32 to vector<4x64xf32>
    %54 = arith.mulf %53, %52 : vector<4x64xf32>
    %c0_23 = arith.constant 0 : index
    %c0_24 = arith.constant 0 : index
    %55 = vector.load %arg2[%c0_23, %c0_24] : memref<8x4xbf16, #tpu.memory_space<vmem>>, vector<8x4xbf16>
    %56 = arith.truncf %54 : vector<4x64xf32> to vector<4x64xbf16>
    %cst_25 = arith.constant dense<0.000000e+00> : vector<8x64xf32>
    %57 = tpu.matmul %55, %56, %cst_25 {dimension_numbers = #tpu.dot_dimension_numbers<[1], [0], [0], [1], [0, 0, 1, 1], [], []>} : vector<8x4xbf16>, vector<4x64xbf16>, vector<8x64xf32> -> vector<8x64xf32>
    %cst_26 = arith.constant 0.000000e+00 : f32
    %58 = vector.broadcast %cst_26 : f32 to vector<8x64xf32>
    %c1_i32_27 = arith.constant 1 : i32
    %59 = tpu.dynamic_rotate %57 by %c1_i32_27 dim 1 : vector<8x64xf32>, i32 -> vector<8x64xf32>
    %60 = arith.select %19, %59, %58 : vector<8x64xi1>, vector<8x64xf32>
    %c63_i32 = arith.constant 63 : i32
    %61 = tpu.dynamic_rotate %57 by %c63_i32 dim 1 : vector<8x64xf32>, i32 -> vector<8x64xf32>
    %62 = arith.select %37, %61, %58 : vector<8x64xi1>, vector<8x64xf32>
    %63 = tpu.concatenate %60, %57, %62 in 0 : vector<8x64xf32>, vector<8x64xf32>, vector<8x64xf32> -> vector<24x64xf32>
    %cst_28 = arith.constant 0.000000e+00 : f32
    %64 = vector.broadcast %cst_28 : f32 to vector<24x64xf32>
    %c8_i32_29 = arith.constant 8 : i32
    %65 = tpu.dynamic_rotate %63 by %c8_i32_29 dim 1 : vector<24x64xf32>, i32 -> vector<24x64xf32>
    %66 = arith.select %39, %65, %64 : vector<24x64xi1>, vector<24x64xf32>
    %c56_i32_30 = arith.constant 56 : i32
    %67 = tpu.dynamic_rotate %63 by %c56_i32_30 dim 1 : vector<24x64xf32>, i32 -> vector<24x64xf32>
    %68 = arith.select %41, %67, %64 : vector<24x64xi1>, vector<24x64xf32>
    %69 = tpu.concatenate %66, %63, %68 in 0 : vector<24x64xf32>, vector<24x64xf32>, vector<24x64xf32> -> vector<72x64xf32>
    %c0_31 = arith.constant 0 : index
    %c0_32 = arith.constant 0 : index
    %70 = vector.load %arg3[%c0_31, %c0_32] : memref<8x72xbf16, #tpu.memory_space<vmem>>, vector<8x72xbf16>
    %71 = arith.truncf %69 : vector<72x64xf32> to vector<72x64xbf16>
    %cst_33 = arith.constant dense<0.000000e+00> : vector<8x64xf32>
    %72 = tpu.matmul %70, %71, %cst_33 {dimension_numbers = #tpu.dot_dimension_numbers<[1], [0], [0], [1], [0, 0, 1, 1], [], []>} : vector<8x72xbf16>, vector<72x64xbf16>, vector<8x64xf32> -> vector<8x64xf32>
    %cst_34 = arith.constant 0.000000e+00 : f32
    %73 = vector.broadcast %cst_34 : f32 to vector<8x64xf32>
    %74 = arith.maximumf %72, %73 : vector<8x64xf32>
    %cst_35 = arith.constant 0.000000e+00 : f32
    %75 = vector.broadcast %cst_35 : f32 to vector<8x64xf32>
    %c1_i32_36 = arith.constant 1 : i32
    %76 = tpu.dynamic_rotate %74 by %c1_i32_36 dim 1 : vector<8x64xf32>, i32 -> vector<8x64xf32>
    %77 = arith.select %19, %76, %75 : vector<8x64xi1>, vector<8x64xf32>
    %c63_i32_37 = arith.constant 63 : i32
    %78 = tpu.dynamic_rotate %74 by %c63_i32_37 dim 1 : vector<8x64xf32>, i32 -> vector<8x64xf32>
    %79 = arith.select %37, %78, %75 : vector<8x64xi1>, vector<8x64xf32>
    %80 = tpu.concatenate %77, %74, %79 in 0 : vector<8x64xf32>, vector<8x64xf32>, vector<8x64xf32> -> vector<24x64xf32>
    %cst_38 = arith.constant 0.000000e+00 : f32
    %81 = vector.broadcast %cst_38 : f32 to vector<24x64xf32>
    %c8_i32_39 = arith.constant 8 : i32
    %82 = tpu.dynamic_rotate %80 by %c8_i32_39 dim 1 : vector<24x64xf32>, i32 -> vector<24x64xf32>
    %83 = arith.select %39, %82, %81 : vector<24x64xi1>, vector<24x64xf32>
    %c56_i32_40 = arith.constant 56 : i32
    %84 = tpu.dynamic_rotate %80 by %c56_i32_40 dim 1 : vector<24x64xf32>, i32 -> vector<24x64xf32>
    %85 = arith.select %41, %84, %81 : vector<24x64xi1>, vector<24x64xf32>
    %86 = tpu.concatenate %83, %80, %85 in 0 : vector<24x64xf32>, vector<24x64xf32>, vector<24x64xf32> -> vector<72x64xf32>
    %c0_41 = arith.constant 0 : index
    %c0_42 = arith.constant 0 : index
    %87 = vector.load %arg4[%c0_41, %c0_42] : memref<8x72xbf16, #tpu.memory_space<vmem>>, vector<8x72xbf16>
    %88 = arith.truncf %86 : vector<72x64xf32> to vector<72x64xbf16>
    %cst_43 = arith.constant dense<0.000000e+00> : vector<8x64xf32>
    %89 = tpu.matmul %87, %88, %cst_43 {dimension_numbers = #tpu.dot_dimension_numbers<[1], [0], [0], [1], [0, 0, 1, 1], [], []>} : vector<8x72xbf16>, vector<72x64xbf16>, vector<8x64xf32> -> vector<8x64xf32>
    %cst_44 = arith.constant dense<0.000000e+00> : vector<8xf32>
    %90 = vector.multi_reduction <add>, %89, %cst_44 [1] : vector<8x64xf32> to vector<8xf32>
    %91 = vector.shape_cast %90 : vector<8xf32> to vector<8x1xf32>
    %c0_45 = arith.constant 0 : index
    %c0_46 = arith.constant 0 : index
    %92 = vector.load %arg5[%c0_45, %c0_46] : memref<2x8xf32, #tpu.memory_space<vmem>>, vector<2x8xf32>
    %cst_47 = arith.constant dense<0.000000e+00> : vector<2x1xf32>
    %93 = tpu.matmul %92, %91, %cst_47 {dimension_numbers = #tpu.dot_dimension_numbers<[1], [0], [0], [1], [0, 0, 1, 1], [], []>} : vector<2x8xf32>, vector<8x1xf32>, vector<2x1xf32> -> vector<2x1xf32>
    %cst_48 = arith.constant 0.000000e+00 : f32
    %94 = vector.broadcast %cst_48 : f32 to vector<2x1xf32>
    %95 = arith.maximumf %93, %94 : vector<2x1xf32>
    %cst_49 = arith.constant 0.000000e+00 : f32
    %96 = vector.broadcast %cst_49 : f32 to vector<8x1xf32>
    %c0_50 = arith.constant 0 : index
    %c0_51 = arith.constant 0 : index
    %97 = vector.load %arg6[%c0_50, %c0_51] : memref<8x2xf32, #tpu.memory_space<vmem>>, vector<8x1xf32>
    %98 = vector.extract_strided_slice %95 {offsets = [0, 0], sizes = [1, 1], strides = [1, 1]} : vector<2x1xf32> to vector<1x1xf32>
    %99 = vector.broadcast %98 : vector<1x1xf32> to vector<8x1xf32>
    %100 = arith.mulf %97, %99 : vector<8x1xf32>
    %101 = arith.addf %96, %100 : vector<8x1xf32>
    %c0_52 = arith.constant 0 : index
    %c1_53 = arith.constant 1 : index
    %102 = vector.load %arg6[%c0_52, %c1_53] : memref<8x2xf32, #tpu.memory_space<vmem>>, vector<8x1xf32>
    %103 = vector.extract_strided_slice %95 {offsets = [1, 0], sizes = [1, 1], strides = [1, 1]} : vector<2x1xf32> to vector<1x1xf32>
    %104 = vector.broadcast %103 : vector<1x1xf32> to vector<8x1xf32>
    %105 = arith.mulf %102, %104 : vector<8x1xf32>
    %106 = arith.addf %101, %105 : vector<8x1xf32>
    %107 = arith.negf %106 : vector<8x1xf32>
    %108 = math.exp %107 : vector<8x1xf32>
    %cst_54 = arith.constant 1.000000e+00 : f32
    %109 = vector.broadcast %cst_54 : f32 to vector<8x1xf32>
    %110 = arith.addf %109, %108 : vector<8x1xf32>
    %111 = arith.divf %109, %110 : vector<8x1xf32>
    %112 = vector.broadcast %111 : vector<8x1xf32> to vector<8x64xf32>
    %113 = arith.mulf %89, %112 : vector<8x64xf32>
    %114 = arith.addf %113, %57 : vector<8x64xf32>
    %cst_55 = arith.constant 0.000000e+00 : f32
    %115 = vector.broadcast %cst_55 : f32 to vector<8x64xf32>
    %c1_i32_56 = arith.constant 1 : i32
    %116 = tpu.dynamic_rotate %114 by %c1_i32_56 dim 1 : vector<8x64xf32>, i32 -> vector<8x64xf32>
    %117 = arith.select %19, %116, %115 : vector<8x64xi1>, vector<8x64xf32>
    %c63_i32_57 = arith.constant 63 : i32
    %118 = tpu.dynamic_rotate %114 by %c63_i32_57 dim 1 : vector<8x64xf32>, i32 -> vector<8x64xf32>
    %119 = arith.select %37, %118, %115 : vector<8x64xi1>, vector<8x64xf32>
    %120 = tpu.concatenate %117, %114, %119 in 0 : vector<8x64xf32>, vector<8x64xf32>, vector<8x64xf32> -> vector<24x64xf32>
    %cst_58 = arith.constant 0.000000e+00 : f32
    %121 = vector.broadcast %cst_58 : f32 to vector<24x64xf32>
    %c8_i32_59 = arith.constant 8 : i32
    %122 = tpu.dynamic_rotate %120 by %c8_i32_59 dim 1 : vector<24x64xf32>, i32 -> vector<24x64xf32>
    %123 = arith.select %39, %122, %121 : vector<24x64xi1>, vector<24x64xf32>
    %c56_i32_60 = arith.constant 56 : i32
    %124 = tpu.dynamic_rotate %120 by %c56_i32_60 dim 1 : vector<24x64xf32>, i32 -> vector<24x64xf32>
    %125 = arith.select %41, %124, %121 : vector<24x64xi1>, vector<24x64xf32>
    %126 = tpu.concatenate %123, %120, %125 in 0 : vector<24x64xf32>, vector<24x64xf32>, vector<24x64xf32> -> vector<72x64xf32>
    %c0_61 = arith.constant 0 : index
    %c0_62 = arith.constant 0 : index
    %127 = vector.load %arg7[%c0_61, %c0_62] : memref<8x72xbf16, #tpu.memory_space<vmem>>, vector<8x72xbf16>
    %128 = arith.truncf %126 : vector<72x64xf32> to vector<72x64xbf16>
    %cst_63 = arith.constant dense<0.000000e+00> : vector<8x64xf32>
    %129 = tpu.matmul %127, %128, %cst_63 {dimension_numbers = #tpu.dot_dimension_numbers<[1], [0], [0], [1], [0, 0, 1, 1], [], []>} : vector<8x72xbf16>, vector<72x64xbf16>, vector<8x64xf32> -> vector<8x64xf32>
    %cst_64 = arith.constant 0.000000e+00 : f32
    %130 = vector.broadcast %cst_64 : f32 to vector<8x64xf32>
    %131 = arith.maximumf %129, %130 : vector<8x64xf32>
    %cst_65 = arith.constant 0.000000e+00 : f32
    %132 = vector.broadcast %cst_65 : f32 to vector<8x64xf32>
    %c1_i32_66 = arith.constant 1 : i32
    %133 = tpu.dynamic_rotate %131 by %c1_i32_66 dim 1 : vector<8x64xf32>, i32 -> vector<8x64xf32>
    %134 = arith.select %19, %133, %132 : vector<8x64xi1>, vector<8x64xf32>
    %c63_i32_67 = arith.constant 63 : i32
    %135 = tpu.dynamic_rotate %131 by %c63_i32_67 dim 1 : vector<8x64xf32>, i32 -> vector<8x64xf32>
    %136 = arith.select %37, %135, %132 : vector<8x64xi1>, vector<8x64xf32>
    %137 = tpu.concatenate %134, %131, %136 in 0 : vector<8x64xf32>, vector<8x64xf32>, vector<8x64xf32> -> vector<24x64xf32>
    %cst_68 = arith.constant 0.000000e+00 : f32
    %138 = vector.broadcast %cst_68 : f32 to vector<24x64xf32>
    %c8_i32_69 = arith.constant 8 : i32
    %139 = tpu.dynamic_rotate %137 by %c8_i32_69 dim 1 : vector<24x64xf32>, i32 -> vector<24x64xf32>
    %140 = arith.select %39, %139, %138 : vector<24x64xi1>, vector<24x64xf32>
    %c56_i32_70 = arith.constant 56 : i32
    %141 = tpu.dynamic_rotate %137 by %c56_i32_70 dim 1 : vector<24x64xf32>, i32 -> vector<24x64xf32>
    %142 = arith.select %41, %141, %138 : vector<24x64xi1>, vector<24x64xf32>
    %143 = tpu.concatenate %140, %137, %142 in 0 : vector<24x64xf32>, vector<24x64xf32>, vector<24x64xf32> -> vector<72x64xf32>
    %c0_71 = arith.constant 0 : index
    %c0_72 = arith.constant 0 : index
    %144 = vector.load %arg8[%c0_71, %c0_72] : memref<8x72xbf16, #tpu.memory_space<vmem>>, vector<8x72xbf16>
    %145 = arith.truncf %143 : vector<72x64xf32> to vector<72x64xbf16>
    %cst_73 = arith.constant dense<0.000000e+00> : vector<8x64xf32>
    %146 = tpu.matmul %144, %145, %cst_73 {dimension_numbers = #tpu.dot_dimension_numbers<[1], [0], [0], [1], [0, 0, 1, 1], [], []>} : vector<8x72xbf16>, vector<72x64xbf16>, vector<8x64xf32> -> vector<8x64xf32>
    %cst_74 = arith.constant dense<0.000000e+00> : vector<8xf32>
    %147 = vector.multi_reduction <add>, %146, %cst_74 [1] : vector<8x64xf32> to vector<8xf32>
    %148 = vector.shape_cast %147 : vector<8xf32> to vector<8x1xf32>
    %c0_75 = arith.constant 0 : index
    %c0_76 = arith.constant 0 : index
    %149 = vector.load %arg9[%c0_75, %c0_76] : memref<2x8xf32, #tpu.memory_space<vmem>>, vector<2x8xf32>
    %cst_77 = arith.constant dense<0.000000e+00> : vector<2x1xf32>
    %150 = tpu.matmul %149, %148, %cst_77 {dimension_numbers = #tpu.dot_dimension_numbers<[1], [0], [0], [1], [0, 0, 1, 1], [], []>} : vector<2x8xf32>, vector<8x1xf32>, vector<2x1xf32> -> vector<2x1xf32>
    %cst_78 = arith.constant 0.000000e+00 : f32
    %151 = vector.broadcast %cst_78 : f32 to vector<2x1xf32>
    %152 = arith.maximumf %150, %151 : vector<2x1xf32>
    %cst_79 = arith.constant 0.000000e+00 : f32
    %153 = vector.broadcast %cst_79 : f32 to vector<8x1xf32>
    %c0_80 = arith.constant 0 : index
    %c0_81 = arith.constant 0 : index
    %154 = vector.load %arg10[%c0_80, %c0_81] : memref<8x2xf32, #tpu.memory_space<vmem>>, vector<8x1xf32>
    %155 = vector.extract_strided_slice %152 {offsets = [0, 0], sizes = [1, 1], strides = [1, 1]} : vector<2x1xf32> to vector<1x1xf32>
    %156 = vector.broadcast %155 : vector<1x1xf32> to vector<8x1xf32>
    %157 = arith.mulf %154, %156 : vector<8x1xf32>
    %158 = arith.addf %153, %157 : vector<8x1xf32>
    %c0_82 = arith.constant 0 : index
    %c1_83 = arith.constant 1 : index
    %159 = vector.load %arg10[%c0_82, %c1_83] : memref<8x2xf32, #tpu.memory_space<vmem>>, vector<8x1xf32>
    %160 = vector.extract_strided_slice %152 {offsets = [1, 0], sizes = [1, 1], strides = [1, 1]} : vector<2x1xf32> to vector<1x1xf32>
    %161 = vector.broadcast %160 : vector<1x1xf32> to vector<8x1xf32>
    %162 = arith.mulf %159, %161 : vector<8x1xf32>
    %163 = arith.addf %158, %162 : vector<8x1xf32>
    %164 = arith.negf %163 : vector<8x1xf32>
    %165 = math.exp %164 : vector<8x1xf32>
    %cst_84 = arith.constant 1.000000e+00 : f32
    %166 = vector.broadcast %cst_84 : f32 to vector<8x1xf32>
    %167 = arith.addf %166, %165 : vector<8x1xf32>
    %168 = arith.divf %166, %167 : vector<8x1xf32>
    %169 = vector.broadcast %168 : vector<8x1xf32> to vector<8x64xf32>
    %170 = arith.mulf %146, %169 : vector<8x64xf32>
    %171 = arith.addf %170, %114 : vector<8x64xf32>
    %c0_85 = arith.constant 0 : index
    %c0_86 = arith.constant 0 : index
    %c0_87 = arith.constant 0 : index
    %172 = vector.load %arg11[%c0_85, %c0_86, %c0_87] : memref<1x8x64xf32, #tpu.memory_space<vmem>>, vector<1x8x64xf32>
    %173 = vector.shape_cast %172 : vector<1x8x64xf32> to vector<8x64xf32>
    %174 = vector.shape_cast %171 : vector<8x64xf32> to vector<1x8x64xf32>
    tpu.vector_store %arg11[%c0_85, %c0_86, %c0_87], %174 {strides = array<i32>} : memref<1x8x64xf32, #tpu.memory_space<vmem>>, vector<1x8x64xf32>,
    return
  }
  func.func @transform_0(%arg0: i32) -> (i32, i32, i32, i32) {
    %c0_i32 = arith.constant 0 : i32
    %c0_i32_0 = arith.constant 0 : i32
    %c0_i32_1 = arith.constant 0 : i32
    %c0_i32_2 = arith.constant 0 : i32
    return %arg0, %c0_i32, %c0_i32_0, %c0_i32_1 : i32, i32, i32, i32
  }
  func.func @transform_1(%arg0: i32) -> (i32, i32) {
    %c0_i32 = arith.constant 0 : i32
    %c0_i32_0 = arith.constant 0 : i32
    %c0_i32_1 = arith.constant 0 : i32
    return %c0_i32, %c0_i32_0 : i32, i32
  }
  func.func @transform_2(%arg0: i32) -> (i32, i32) {
    %c0_i32 = arith.constant 0 : i32
    %c0_i32_0 = arith.constant 0 : i32
    %c0_i32_1 = arith.constant 0 : i32
    return %c0_i32, %c0_i32_0 : i32, i32
  }
  func.func @transform_3(%arg0: i32) -> (i32, i32) {
    %c0_i32 = arith.constant 0 : i32
    %c0_i32_0 = arith.constant 0 : i32
    %c0_i32_1 = arith.constant 0 : i32
    return %c0_i32, %c0_i32_0 : i32, i32
  }
  func.func @transform_4(%arg0: i32) -> (i32, i32) {
    %c0_i32 = arith.constant 0 : i32
    %c0_i32_0 = arith.constant 0 : i32
    %c0_i32_1 = arith.constant 0 : i32
    return %c0_i32, %c0_i32_0 : i32, i32
  }
  func.func @transform_5(%arg0: i32) -> (i32, i32) {
    %c0_i32 = arith.constant 0 : i32
    %c0_i32_0 = arith.constant 0 : i32
    %c0_i32_1 = arith.constant 0 : i32
    return %c0_i32, %c0_i32_0 : i32, i32
  }
  func.func @transform_6(%arg0: i32) -> (i32, i32) {
    %c0_i32 = arith.constant 0 : i32
    %c0_i32_0 = arith.constant 0 : i32
    %c0_i32_1 = arith.constant 0 : i32
    return %c0_i32, %c0_i32_0 : i32, i32
  }
  func.func @transform_7(%arg0: i32) -> (i32, i32) {
    %c0_i32 = arith.constant 0 : i32
    %c0_i32_0 = arith.constant 0 : i32
    %c0_i32_1 = arith.constant 0 : i32
    return %c0_i32, %c0_i32_0 : i32, i32
  }
  func.func @transform_8(%arg0: i32) -> (i32, i32) {
    %c0_i32 = arith.constant 0 : i32
    %c0_i32_0 = arith.constant 0 : i32
    %c0_i32_1 = arith.constant 0 : i32
    return %c0_i32, %c0_i32_0 : i32, i32
  }
  func.func @transform_9(%arg0: i32) -> (i32, i32) {
    %c0_i32 = arith.constant 0 : i32
    %c0_i32_0 = arith.constant 0 : i32
    %c0_i32_1 = arith.constant 0 : i32
    return %c0_i32, %c0_i32_0 : i32, i32
  }
  func.func @transform_10(%arg0: i32) -> (i32, i32, i32) {
    %c0_i32 = arith.constant 0 : i32
    %c0_i32_0 = arith.constant 0 : i32
    %c0_i32_1 = arith.constant 0 : i32
    return %arg0, %c0_i32, %c0_i32_0 : i32, i32, i32
  }
}

module attributes {stable_mosaic.version = 11 : i64} {
  func.func @kernel(%arg0: i32, %arg1: memref<1x4x4x64xf32, #tpu.memory_space<vmem>>, %arg2: memref<8x4xbf16, #tpu.memory_space<vmem>>, %arg3: memref<8x72xbf16, #tpu.memory_space<vmem>>, %arg4: memref<8x72xbf16, #tpu.memory_space<vmem>>, %arg5: memref<2x8xf32, #tpu.memory_space<vmem>>, %arg6: memref<8x2xf32, #tpu.memory_space<vmem>>, %arg7: memref<8x72xbf16, #tpu.memory_space<vmem>>, %arg8: memref<8x72xbf16, #tpu.memory_space<vmem>>, %arg9: memref<2x8xf32, #tpu.memory_space<vmem>>, %arg10: memref<8x2xf32, #tpu.memory_space<vmem>>, %arg11: memref<1x8x64xf32, #tpu.memory_space<vmem>>) attributes {dimension_semantics = [#tpu.dimension_semantics<parallel>], iteration_bounds = array<i64: 2>, scalar_prefetch = 0 : i64, scratch_operands = 0 : i64, tpu.core_type = #tpu.core_type<tc>, window_params = [{transform_indices = @transform_0, window_bounds = array<i64: 1, 4, 4, 64>}, {pipeline_mode = #tpu.pipeline_mode<synchronous>, transform_indices = @transform_1, window_bounds = array<i64: 8, 4>}, {pipeline_mode = #tpu.pipeline_mode<synchronous>, transform_indices = @transform_2, window_bounds = array<i64: 8, 72>}, {pipeline_mode = #tpu.pipeline_mode<synchronous>, transform_indices = @transform_3, window_bounds = array<i64: 8, 72>}, {pipeline_mode = #tpu.pipeline_mode<synchronous>, transform_indices = @transform_4, window_bounds = array<i64: 2, 8>}, {pipeline_mode = #tpu.pipeline_mode<synchronous>, transform_indices = @transform_5, window_bounds = array<i64: 8, 2>}, {pipeline_mode = #tpu.pipeline_mode<synchronous>, transform_indices = @transform_6, window_bounds = array<i64: 8, 72>}, {pipeline_mode = #tpu.pipeline_mode<synchronous>, transform_indices = @transform_7, window_bounds = array<i64: 8, 72>}, {pipeline_mode = #tpu.pipeline_mode<synchronous>, transform_indices = @transform_8, window_bounds = array<i64: 2, 8>}, {pipeline_mode = #tpu.pipeline_mode<synchronous>, transform_indices = @transform_9, window_bounds = array<i64: 8, 2>}, {transform_indices = @transform_10, window_bounds = array<i64: 1, 8, 64>}]} {
    %0 = tpu.iota {dimensions = array<i32: 1>} : vector<8x64xi32>
    %1 = tpu.iota {dimensions = array<i32: 1>} : vector<24x64xi32>
    %c8_i32 = arith.constant 8 : i32
    %c0_i32 = arith.constant 0 : i32
    %2 = arith.cmpi eq, %c8_i32, %c0_i32 : i32
    %c1_i32 = arith.constant 1 : i32
    %3 = arith.select %2, %c1_i32, %c8_i32 : i32
    %4 = vector.broadcast %3 : i32 to vector<8x64xi32>
    %5 = arith.remsi %0, %4 : vector<8x64xi32>
    %c0_i32_0 = arith.constant 0 : i32
    %6 = vector.broadcast %c0_i32_0 : i32 to vector<8x64xi32>
    %7 = arith.cmpi ne, %5, %6 : vector<8x64xi32>
    %c0_i32_1 = arith.constant 0 : i32
    %8 = vector.broadcast %c0_i32_1 : i32 to vector<8x64xi32>
    %9 = arith.cmpi slt, %5, %8 : vector<8x64xi32>
    %c0_i32_2 = arith.constant 0 : i32
    %10 = arith.cmpi slt, %3, %c0_i32_2 : i32
    %11 = vector.broadcast %10 : i1 to vector<8x64xi1>
    %12 = vector.broadcast %11 : vector<8x64xi1> to vector<8x64xi1>
    %13 = arith.xori %9, %12 : vector<8x64xi1>
    %14 = arith.andi %13, %7 : vector<8x64xi1>
    %15 = vector.broadcast %3 : i32 to vector<8x64xi32>
    %16 = arith.addi %5, %15 : vector<8x64xi32>
    %17 = arith.select %14, %16, %5 : vector<8x64xi1>, vector<8x64xi32>
    %c0_i32_3 = arith.constant 0 : i32
    %18 = vector.broadcast %c0_i32_3 : i32 to vector<8x64xi32>
    %19 = arith.cmpi sgt, %17, %18 : vector<8x64xi32>
    %c8_i32_4 = arith.constant 8 : i32
    %c0_i32_5 = arith.constant 0 : i32
    %20 = arith.cmpi eq, %c8_i32_4, %c0_i32_5 : i32
    %c1_i32_6 = arith.constant 1 : i32
    %21 = arith.select %20, %c1_i32_6, %c8_i32_4 : i32
    %22 = vector.broadcast %21 : i32 to vector<8x64xi32>
    %23 = arith.remsi %0, %22 : vector<8x64xi32>
    %c0_i32_7 = arith.constant 0 : i32
    %24 = vector.broadcast %c0_i32_7 : i32 to vector<8x64xi32>
    %25 = arith.cmpi ne, %23, %24 : vector<8x64xi32>
    %c0_i32_8 = arith.constant 0 : i32
    %26 = vector.broadcast %c0_i32_8 : i32 to vector<8x64xi32>
    %27 = arith.cmpi slt, %23, %26 : vector<8x64xi32>
    %c0_i32_9 = arith.constant 0 : i32
    %28 = arith.cmpi slt, %21, %c0_i32_9 : i32
    %29 = vector.broadcast %28 : i1 to vector<8x64xi1>
    %30 = vector.broadcast %29 : vector<8x64xi1> to vector<8x64xi1>
    %31 = arith.xori %27, %30 : vector<8x64xi1>
    %32 = arith.andi %31, %25 : vector<8x64xi1>
    %33 = vector.broadcast %21 : i32 to vector<8x64xi32>
    %34 = arith.addi %23, %33 : vector<8x64xi32>
    %35 = arith.select %32, %34, %23 : vector<8x64xi1>, vector<8x64xi32>
    %c7_i32 = arith.constant 7 : i32
    %36 = vector.broadcast %c7_i32 : i32 to vector<8x64xi32>
    %37 = arith.cmpi slt, %35, %36 : vector<8x64xi32>
    %c8_i32_10 = arith.constant 8 : i32
    %38 = vector.broadcast %c8_i32_10 : i32 to vector<24x64xi32>
    %39 = arith.cmpi sge, %1, %38 : vector<24x64xi32>
    %c56_i32 = arith.constant 56 : i32
    %40 = vector.broadcast %c56_i32 : i32 to vector<24x64xi32>
    %41 = arith.cmpi slt, %1, %40 : vector<24x64xi32>
    %c0 = arith.constant 0 : index
    %c0_11 = arith.constant 0 : index
    %c0_12 = arith.constant 0 : index
    %c0_13 = arith.constant 0 : index
    %42 = vector.load %arg1[%c0, %c0_11, %c0_12, %c0_13] : memref<1x4x4x64xf32, #tpu.memory_space<vmem>>, vector<1x1x4x64xf32>
    %43 = vector.shape_cast %42 : vector<1x1x4x64xf32> to vector<4x64xf32>
    %c0_14 = arith.constant 0 : index
    %c1 = arith.constant 1 : index
    %c0_15 = arith.constant 0 : index
    %c0_16 = arith.constant 0 : index
    %44 = vector.load %arg1[%c0_14, %c1, %c0_15, %c0_16] : memref<1x4x4x64xf32, #tpu.memory_space<vmem>>, vector<1x1x4x64xf32>
    %45 = vector.shape_cast %44 : vector<1x1x4x64xf32> to vector<4x64xf32>
    %46 = arith.addf %43, %45 : vector<4x64xf32>
    %c0_17 = arith.constant 0 : index
    %c2 = arith.constant 2 : index
    %c0_18 = arith.constant 0 : index
    %c0_19 = arith.constant 0 : index
    %47 = vector.load %arg1[%c0_17, %c2, %c0_18, %c0_19] : memref<1x4x4x64xf32, #tpu.memory_space<vmem>>, vector<1x1x4x64xf32>
    %48 = vector.shape_cast %47 : vector<1x1x4x64xf32> to vector<4x64xf32>
    %49 = arith.addf %46, %48 : vector<4x64xf32>
    %c0_20 = arith.constant 0 : index
    %c3 = arith.constant 3 : index
    %c0_21 = arith.constant 0 : index
    %c0_22 = arith.constant 0 : index
    %50 = vector.load %arg1[%c0_20, %c3, %c0_21, %c0_22] : memref<1x4x4x64xf32, #tpu.memory_space<vmem>>, vector<1x1x4x64xf32>
    %51 = vector.shape_cast %50 : vector<1x1x4x64xf32> to vector<4x64xf32>
    %52 = arith.addf %49, %51 : vector<4x64xf32>
    %cst = arith.constant 2.500000e-01 : f32
    %53 = vector.broadcast %cst : f32 to vector<4x64xf32>
    %54 = arith.mulf %53, %52 : vector<4x64xf32>
    %c0_23 = arith.constant 0 : index
    %c0_24 = arith.constant 0 : index
    %55 = vector.load %arg2[%c0_23, %c0_24] : memref<8x4xbf16, #tpu.memory_space<vmem>>, vector<8x4xbf16>
    %56 = arith.truncf %54 : vector<4x64xf32> to vector<4x64xbf16>
    %cst_25 = arith.constant dense<0.000000e+00> : vector<8x64xf32>
    %57 = tpu.matmul %55, %56, %cst_25 {dimension_numbers = #tpu.dot_dimension_numbers<[1], [0], [0], [1], [0, 0, 1, 1], [], []>} : vector<8x4xbf16>, vector<4x64xbf16>, vector<8x64xf32> -> vector<8x64xf32>
    %cst_26 = arith.constant 0.000000e+00 : f32
    %58 = vector.broadcast %cst_26 : f32 to vector<8x64xf32>
    %c1_i32_27 = arith.constant 1 : i32
    %59 = tpu.dynamic_rotate %57 by %c1_i32_27 dim 1 : vector<8x64xf32>, i32 -> vector<8x64xf32>
    %60 = arith.select %19, %59, %58 : vector<8x64xi1>, vector<8x64xf32>
    %c63_i32 = arith.constant 63 : i32
    %61 = tpu.dynamic_rotate %57 by %c63_i32 dim 1 : vector<8x64xf32>, i32 -> vector<8x64xf32>
    %62 = arith.select %37, %61, %58 : vector<8x64xi1>, vector<8x64xf32>
    %63 = tpu.concatenate %60, %57, %62 in 0 : vector<8x64xf32>, vector<8x64xf32>, vector<8x64xf32> -> vector<24x64xf32>
    %cst_28 = arith.constant 0.000000e+00 : f32
    %64 = vector.broadcast %cst_28 : f32 to vector<24x64xf32>
    %c8_i32_29 = arith.constant 8 : i32
    %65 = tpu.dynamic_rotate %63 by %c8_i32_29 dim 1 : vector<24x64xf32>, i32 -> vector<24x64xf32>
    %66 = arith.select %39, %65, %64 : vector<24x64xi1>, vector<24x64xf32>
    %c56_i32_30 = arith.constant 56 : i32
    %67 = tpu.dynamic_rotate %63 by %c56_i32_30 dim 1 : vector<24x64xf32>, i32 -> vector<24x64xf32>
    %68 = arith.select %41, %67, %64 : vector<24x64xi1>, vector<24x64xf32>
    %69 = tpu.concatenate %66, %63, %68 in 0 : vector<24x64xf32>, vector<24x64xf32>, vector<24x64xf32> -> vector<72x64xf32>
    %c0_31 = arith.constant 0 : index
    %c0_32 = arith.constant 0 : index
    %70 = vector.load %arg3[%c0_31, %c0_32] : memref<8x72xbf16, #tpu.memory_space<vmem>>, vector<8x72xbf16>
    %71 = arith.truncf %69 : vector<72x64xf32> to vector<72x64xbf16>
    %cst_33 = arith.constant dense<0.000000e+00> : vector<8x64xf32>
    %72 = tpu.matmul %70, %71, %cst_33 {dimension_numbers = #tpu.dot_dimension_numbers<[1], [0], [0], [1], [0, 0, 1, 1], [], []>} : vector<8x72xbf16>, vector<72x64xbf16>, vector<8x64xf32> -> vector<8x64xf32>
    %cst_34 = arith.constant 0.000000e+00 : f32
    %73 = vector.broadcast %cst_34 : f32 to vector<8x64xf32>
    %74 = arith.maximumf %72, %73 : vector<8x64xf32>
    %cst_35 = arith.constant 0.000000e+00 : f32
    %75 = vector.broadcast %cst_35 : f32 to vector<8x64xf32>
    %c1_i32_36 = arith.constant 1 : i32
    %76 = tpu.dynamic_rotate %74 by %c1_i32_36 dim 1 : vector<8x64xf32>, i32 -> vector<8x64xf32>
    %77 = arith.select %19, %76, %75 : vector<8x64xi1>, vector<8x64xf32>
    %c63_i32_37 = arith.constant 63 : i32
    %78 = tpu.dynamic_rotate %74 by %c63_i32_37 dim 1 : vector<8x64xf32>, i32 -> vector<8x64xf32>
    %79 = arith.select %37, %78, %75 : vector<8x64xi1>, vector<8x64xf32>
    %80 = tpu.concatenate %77, %74, %79 in 0 : vector<8x64xf32>, vector<8x64xf32>, vector<8x64xf32> -> vector<24x64xf32>
    %cst_38 = arith.constant 0.000000e+00 : f32
    %81 = vector.broadcast %cst_38 : f32 to vector<24x64xf32>
    %c8_i32_39 = arith.constant 8 : i32
    %82 = tpu.dynamic_rotate %80 by %c8_i32_39 dim 1 : vector<24x64xf32>, i32 -> vector<24x64xf32>
    %83 = arith.select %39, %82, %81 : vector<24x64xi1>, vector<24x64xf32>
    %c56_i32_40 = arith.constant 56 : i32
    %84 = tpu.dynamic_rotate %80 by %c56_i32_40 dim 1 : vector<24x64xf32>, i32 -> vector<24x64xf32>
    %85 = arith.select %41, %84, %81 : vector<24x64xi1>, vector<24x64xf32>
    %86 = tpu.concatenate %83, %80, %85 in 0 : vector<24x64xf32>, vector<24x64xf32>, vector<24x64xf32> -> vector<72x64xf32>
    %c0_41 = arith.constant 0 : index
    %c0_42 = arith.constant 0 : index
    %87 = vector.load %arg4[%c0_41, %c0_42] : memref<8x72xbf16, #tpu.memory_space<vmem>>, vector<8x72xbf16>
    %88 = arith.truncf %86 : vector<72x64xf32> to vector<72x64xbf16>
    %cst_43 = arith.constant dense<0.000000e+00> : vector<8x64xf32>
    %89 = tpu.matmul %87, %88, %cst_43 {dimension_numbers = #tpu.dot_dimension_numbers<[1], [0], [0], [1], [0, 0, 1, 1], [], []>} : vector<8x72xbf16>, vector<72x64xbf16>, vector<8x64xf32> -> vector<8x64xf32>
    %cst_44 = arith.constant dense<0.000000e+00> : vector<8xf32>
    %90 = vector.multi_reduction <add>, %89, %cst_44 [1] : vector<8x64xf32> to vector<8xf32>
    %91 = vector.shape_cast %90 : vector<8xf32> to vector<8x1xf32>
    %c0_45 = arith.constant 0 : index
    %c0_46 = arith.constant 0 : index
    %92 = vector.load %arg5[%c0_45, %c0_46] : memref<2x8xf32, #tpu.memory_space<vmem>>, vector<2x8xf32>
    %cst_47 = arith.constant dense<0.000000e+00> : vector<2x1xf32>
    %93 = tpu.matmul %92, %91, %cst_47 {dimension_numbers = #tpu.dot_dimension_numbers<[1], [0], [0], [1], [0, 0, 1, 1], [], []>} : vector<2x8xf32>, vector<8x1xf32>, vector<2x1xf32> -> vector<2x1xf32>
    %cst_48 = arith.constant 0.000000e+00 : f32
    %94 = vector.broadcast %cst_48 : f32 to vector<2x1xf32>
    %95 = arith.maximumf %93, %94 : vector<2x1xf32>
    %cst_49 = arith.constant 0.000000e+00 : f32
    %96 = vector.broadcast %cst_49 : f32 to vector<8x1xf32>
    %c0_50 = arith.constant 0 : index
    %c0_51 = arith.constant 0 : index
    %97 = vector.load %arg6[%c0_50, %c0_51] : memref<8x2xf32, #tpu.memory_space<vmem>>, vector<8x1xf32>
    %98 = vector.extract_strided_slice %95 {offsets = [0, 0], sizes = [1, 1], strides = [1, 1]} : vector<2x1xf32> to vector<1x1xf32>
    %99 = vector.broadcast %98 : vector<1x1xf32> to vector<8x1xf32>
    %100 = arith.mulf %97, %99 : vector<8x1xf32>
    %101 = arith.addf %96, %100 : vector<8x1xf32>
    %c0_52 = arith.constant 0 : index
    %c1_53 = arith.constant 1 : index
    %102 = vector.load %arg6[%c0_52, %c1_53] : memref<8x2xf32, #tpu.memory_space<vmem>>, vector<8x1xf32>
    %103 = vector.extract_strided_slice %95 {offsets = [1, 0], sizes = [1, 1], strides = [1, 1]} : vector<2x1xf32> to vector<1x1xf32>
    %104 = vector.broadcast %103 : vector<1x1xf32> to vector<8x1xf32>
    %105 = arith.mulf %102, %104 : vector<8x1xf32>
    %106 = arith.addf %101, %105 : vector<8x1xf32>
    %107 = arith.negf %106 : vector<8x1xf32>
    %108 = math.exp %107 : vector<8x1xf32>
    %cst_54 = arith.constant 1.000000e+00 : f32
    %109 = vector.broadcast %cst_54 : f32 to vector<8x1xf32>
    %110 = arith.addf %109, %108 : vector<8x1xf32>
    %111 = arith.divf %109, %110 : vector<8x1xf32>
    %112 = vector.broadcast %111 : vector<8x1xf32> to vector<8x64xf32>
    %113 = arith.mulf %89, %112 : vector<8x64xf32>
    %114 = arith.addf %113, %57 : vector<8x64xf32>
    %cst_55 = arith.constant 0.000000e+00 : f32
    %115 = vector.broadcast %cst_55 : f32 to vector<8x64xf32>
    %c1_i32_56 = arith.constant 1 : i32
    %116 = tpu.dynamic_rotate %114 by %c1_i32_56 dim 1 : vector<8x64xf32>, i32 -> vector<8x64xf32>
    %117 = arith.select %19, %116, %115 : vector<8x64xi1>, vector<8x64xf32>
    %c63_i32_57 = arith.constant 63 : i32
    %118 = tpu.dynamic_rotate %114 by %c63_i32_57 dim 1 : vector<8x64xf32>, i32 -> vector<8x64xf32>
    %119 = arith.select %37, %118, %115 : vector<8x64xi1>, vector<8x64xf32>
    %120 = tpu.concatenate %117, %114, %119 in 0 : vector<8x64xf32>, vector<8x64xf32>, vector<8x64xf32> -> vector<24x64xf32>
    %cst_58 = arith.constant 0.000000e+00 : f32
    %121 = vector.broadcast %cst_58 : f32 to vector<24x64xf32>
    %c8_i32_59 = arith.constant 8 : i32
    %122 = tpu.dynamic_rotate %120 by %c8_i32_59 dim 1 : vector<24x64xf32>, i32 -> vector<24x64xf32>
    %123 = arith.select %39, %122, %121 : vector<24x64xi1>, vector<24x64xf32>
    %c56_i32_60 = arith.constant 56 : i32
    %124 = tpu.dynamic_rotate %120 by %c56_i32_60 dim 1 : vector<24x64xf32>, i32 -> vector<24x64xf32>
    %125 = arith.select %41, %124, %121 : vector<24x64xi1>, vector<24x64xf32>
    %126 = tpu.concatenate %123, %120, %125 in 0 : vector<24x64xf32>, vector<24x64xf32>, vector<24x64xf32> -> vector<72x64xf32>
    %c0_61 = arith.constant 0 : index
    %c0_62 = arith.constant 0 : index
    %127 = vector.load %arg7[%c0_61, %c0_62] : memref<8x72xbf16, #tpu.memory_space<vmem>>, vector<8x72xbf16>
    %128 = arith.truncf %126 : vector<72x64xf32> to vector<72x64xbf16>
    %cst_63 = arith.constant dense<0.000000e+00> : vector<8x64xf32>
    %129 = tpu.matmul %127, %128, %cst_63 {dimension_numbers = #tpu.dot_dimension_numbers<[1], [0], [0], [1], [0, 0, 1, 1], [], []>} : vector<8x72xbf16>, vector<72x64xbf16>, vector<8x64xf32> -> vector<8x64xf32>
    %cst_64 = arith.constant 0.000000e+00 : f32
    %130 = vector.broadcast %cst_64 : f32 to vector<8x64xf32>
    %131 = arith.maximumf %129, %130 : vector<8x64xf32>
    %cst_65 = arith.constant 0.000000e+00 : f32
    %132 = vector.broadcast %cst_65 : f32 to vector<8x64xf32>
    %c1_i32_66 = arith.constant 1 : i32
    %133 = tpu.dynamic_rotate %131 by %c1_i32_66 dim 1 : vector<8x64xf32>, i32 -> vector<8x64xf32>
    %134 = arith.select %19, %133, %132 : vector<8x64xi1>, vector<8x64xf32>
    %c63_i32_67 = arith.constant 63 : i32
    %135 = tpu.dynamic_rotate %131 by %c63_i32_67 dim 1 : vector<8x64xf32>, i32 -> vector<8x64xf32>
    %136 = arith.select %37, %135, %132 : vector<8x64xi1>, vector<8x64xf32>
    %137 = tpu.concatenate %134, %131, %136 in 0 : vector<8x64xf32>, vector<8x64xf32>, vector<8x64xf32> -> vector<24x64xf32>
    %cst_68 = arith.constant 0.000000e+00 : f32
    %138 = vector.broadcast %cst_68 : f32 to vector<24x64xf32>
    %c8_i32_69 = arith.constant 8 : i32
    %139 = tpu.dynamic_rotate %137 by %c8_i32_69 dim 1 : vector<24x64xf32>, i32 -> vector<24x64xf32>
    %140 = arith.select %39, %139, %138 : vector<24x64xi1>, vector<24x64xf32>
    %c56_i32_70 = arith.constant 56 : i32
    %141 = tpu.dynamic_rotate %137 by %c56_i32_70 dim 1 : vector<24x64xf32>, i32 -> vector<24x64xf32>
    %142 = arith.select %41, %141, %138 : vector<24x64xi1>, vector<24x64xf32>
    %143 = tpu.concatenate %140, %137, %142 in 0 : vector<24x64xf32>, vector<24x64xf32>, vector<24x64xf32> -> vector<72x64xf32>
    %c0_71 = arith.constant 0 : index
    %c0_72 = arith.constant 0 : index
    %144 = vector.load %arg8[%c0_71, %c0_72] : memref<8x72xbf16, #tpu.memory_space<vmem>>, vector<8x72xbf16>
    %145 = arith.truncf %143 : vector<72x64xf32> to vector<72x64xbf16>
    %cst_73 = arith.constant dense<0.000000e+00> : vector<8x64xf32>
    %146 = tpu.matmul %144, %145, %cst_73 {dimension_numbers = #tpu.dot_dimension_numbers<[1], [0], [0], [1], [0, 0, 1, 1], [], []>} : vector<8x72xbf16>, vector<72x64xbf16>, vector<8x64xf32> -> vector<8x64xf32>
    %cst_74 = arith.constant dense<0.000000e+00> : vector<8xf32>
    %147 = vector.multi_reduction <add>, %146, %cst_74 [1] : vector<8x64xf32> to vector<8xf32>
    %148 = vector.shape_cast %147 : vector<8xf32> to vector<8x1xf32>
    %c0_75 = arith.constant 0 : index
    %c0_76 = arith.constant 0 : index
    %149 = vector.load %arg9[%c0_75, %c0_76] : memref<2x8xf32, #tpu.memory_space<vmem>>, vector<2x8xf32>
    %cst_77 = arith.constant dense<0.000000e+00> : vector<2x1xf32>
    %150 = tpu.matmul %149, %148, %cst_77 {dimension_numbers = #tpu.dot_dimension_numbers<[1], [0], [0], [1], [0, 0, 1, 1], [], []>} : vector<2x8xf32>, vector<8x1xf32>, vector<2x1xf32> -> vector<2x1xf32>
    %cst_78 = arith.constant 0.000000e+00 : f32
    %151 = vector.broadcast %cst_78 : f32 to vector<2x1xf32>
    %152 = arith.maximumf %150, %151 : vector<2x1xf32>
    %cst_79 = arith.constant 0.000000e+00 : f32
    %153 = vector.broadcast %cst_79 : f32 to vector<8x1xf32>
    %c0_80 = arith.constant 0 : index
    %c0_81 = arith.constant 0 : index
    %154 = vector.load %arg10[%c0_80, %c0_81] : memref<8x2xf32, #tpu.memory_space<vmem>>, vector<8x1xf32>
    %155 = vector.extract_strided_slice %152 {offsets = [0, 0], sizes = [1, 1], strides = [1, 1]} : vector<2x1xf32> to vector<1x1xf32>
    %156 = vector.broadcast %155 : vector<1x1xf32> to vector<8x1xf32>
    %157 = arith.mulf %154, %156 : vector<8x1xf32>
    %158 = arith.addf %153, %157 : vector<8x1xf32>
    %c0_82 = arith.constant 0 : index
    %c1_83 = arith.constant 1 : index
    %159 = vector.load %arg10[%c0_82, %c1_83] : memref<8x2xf32, #tpu.memory_space<vmem>>, vector<8x1xf32>
    %160 = vector.extract_strided_slice %152 {offsets = [1, 0], sizes = [1, 1], strides = [1, 1]} : vector<2x1xf32> to vector<1x1xf32>
    %161 = vector.broadcast %160 : vector<1x1xf32> to vector<8x1xf32>
    %162 = arith.mulf %159, %161 : vector<8x1xf32>
    %163 = arith.addf %158, %162 : vector<8x1xf32>
    %164 = arith.negf %163 : vector<8x1xf32>
    %165 = math.exp %164 : vector<8x1xf32>
    %cst_84 = arith.constant 1.000000e+00 : f32
    %166 = vector.broadcast %cst_84 : f32 to vector<8x1xf32>
    %167 = arith.addf %166, %165 : vector<8x1xf32>
    %168 = arith.divf %166, %167 : vector<8x1xf32>
    %169 = vector.broadcast %168 : vector<8x1xf32> to vector<8x64xf32>
    %170 = arith.mulf %146, %169 : vector<8x64xf32>
    %171 = arith.addf %170, %114 : vector<8x64xf32>
    %c0_85 = arith.constant 0 : index
    %c0_86 = arith.constant 0 : index
    %c0_87 = arith.constant 0 : index
    %172 = vector.load %arg11[%c0_85, %c0_86, %c0_87] : memref<1x8x64xf32, #tpu.memory_space<vmem>>, vector<1x8x64xf32>
    %173 = vector.shape_cast %172 : vector<1x8x64xf32> to vector<8x64xf32>
    %174 = vector.shape_cast %171 : vector<8x64xf32> to vector<1x8x64xf32>
    tpu.vector_store %arg11[%c0_85, %c0_86, %c0_87], %174 {strides = array<i32>} : memref<1x8x64xf32, #tpu.memory_space<vmem>>, vector<1x8x64xf32>,
    return
  }
  func.func @transform_0(%arg0: i32) -> (i32, i32, i32, i32) {
    %c0_i32 = arith.constant 0 : i32
    %c0_i32_0 = arith.constant 0 : i32
    %c0_i32_1 = arith.constant 0 : i32
    %c0_i32_2 = arith.constant 0 : i32
    return %arg0, %c0_i32, %c0_i32_0, %c0_i32_1 : i32, i32, i32, i32
  }
  func.func @transform_1(%arg0: i32) -> (i32, i32) {
    %c0_i32 = arith.constant 0 : i32
    %c0_i32_0 = arith.constant 0 : i32
    %c0_i32_1 = arith.constant 0 : i32
    return %c0_i32, %c0_i32_0 : i32, i32
  }
  func.func @transform_2(%arg0: i32) -> (i32, i32) {
    %c0_i32 = arith.constant 0 : i32
    %c0_i32_0 = arith.constant 0 : i32
    %c0_i32_1 = arith.constant 0 : i32
    return %c0_i32, %c0_i32_0 : i32, i32
  }
  func.func @transform_3(%arg0: i32) -> (i32, i32) {
    %c0_i32 = arith.constant 0 : i32
    %c0_i32_0 = arith.constant 0 : i32
    %c0_i32_1 = arith.constant 0 : i32
    return %c0_i32, %c0_i32_0 : i32, i32
  }
  func.func @transform_4(%arg0: i32) -> (i32, i32) {
    %c0_i32 = arith.constant 0 : i32
    %c0_i32_0 = arith.constant 0 : i32
    %c0_i32_1 = arith.constant 0 : i32
    return %c0_i32, %c0_i32_0 : i32, i32
  }
  func.func @transform_5(%arg0: i32) -> (i32, i32) {
    %c0_i32 = arith.constant 0 : i32
    %c0_i32_0 = arith.constant 0 : i32
    %c0_i32_1 = arith.constant 0 : i32
    return %c0_i32, %c0_i32_0 : i32, i32
  }
  func.func @transform_6(%arg0: i32) -> (i32, i32) {
    %c0_i32 = arith.constant 0 : i32
    %c0_i32_0 = arith.constant 0 : i32
    %c0_i32_1 = arith.constant 0 : i32
    return %c0_i32, %c0_i32_0 : i32, i32
  }
  func.func @transform_7(%arg0: i32) -> (i32, i32) {
    %c0_i32 = arith.constant 0 : i32
    %c0_i32_0 = arith.constant 0 : i32
    %c0_i32_1 = arith.constant 0 : i32
    return %c0_i32, %c0_i32_0 : i32, i32
  }
  func.func @transform_8(%arg0: i32) -> (i32, i32) {
    %c0_i32 = arith.constant 0 : i32
    %c0_i32_0 = arith.constant 0 : i32
    %c0_i32_1 = arith.constant 0 : i32
    return %c0_i32, %c0_i32_0 : i32, i32
  }
  func.func @transform_9(%arg0: i32) -> (i32, i32) {
    %c0_i32 = arith.constant 0 : i32
    %c0_i32_0 = arith.constant 0 : i32
    %c0_i32_1 = arith.constant 0 : i32
    return %c0_i32, %c0_i32_0 : i32, i32
  }
  func.func @transform_10(%arg0: i32) -> (i32, i32, i32) {
    %c0_i32 = arith.constant 0 : i32
    %c0_i32_0 = arith.constant 0 : i32
    %c0_i32_1 = arith.constant 0 : i32
    return %arg0, %c0_i32, %c0_i32_0 : i32, i32, i32
  }
}

</mosaic_0001>

<bundles_post_ra>
// kernel: tpu_custom_call.1
= control target key start
LH: loop header
LB: loop body
LE: loop exit
PB: predicated region body
PF: predicated region fallthrough
CT: control target
= control target key end

     0   :  { %15 = vsyncpa [#allocation3], 0  ;;  %s2079_s0 = inlined_call_operand.hbm [shape: f32[2,4,4,64], index: 0, kind: input, shape index: {}]   ;;  %s2080_s1 = inlined_call_operand.vmem [shape: bf16[8,4], index: 1, kind: input, shape index: {}]   ;;  %s2081_s2 = inlined_call_operand.vmem [shape: bf16[8,72], index: 2, kind: input, shape index: {}]   ;;  %s2082_s3 = inlined_call_operand.vmem [shape: bf16[8,72], index: 3, kind: input, shape index: {}]   ;;  %s2083_s4 = inlined_call_operand.vmem [shape: f32[2,8], index: 4, kind: input, shape index: {}]   ;;  %s2084_s5 = inlined_call_operand.vmem [shape: f32[8,2], index: 5, kind: input, shape index: {}]   ;;  %s2085_s6 = inlined_call_operand.vmem [shape: bf16[8,72], index: 6, kind: input, shape index: {}]   ;;  %s2086_s7 = inlined_call_operand.vmem [shape: bf16[8,72], index: 7, kind: input, shape index: {}]   ;;  %s2087_s8 = inlined_call_operand.vmem [shape: f32[2,8], index: 8, kind: input, shape index: {}]   ;;  %s2088_s9 = inlined_call_operand.vmem [shape: f32[8,2], index: 9, kind: input, shape index: {}]   ;;  %s2089_s10 = inlined_call_operand.hbm [shape: f32[2,8,64], index: 10, kind: output, shape index: {}]  }
   0x1   :  { %17 = vsyncpa [#allocation3 + $0x1], 0 }
   0x2   :  { %18 = vsyncpa [#allocation4], 0 }
   0x3   :  { %20 = vsyncpa [#allocation4 + $0x1], 0  ;;  %s1645_s13 = smov 0   ;;  %s1647_s14 = smov 0  }
   0x4   :  { %s1649_s15 = smov 0   ;;  %s1651_s16 = smov 0  }
   0x5 LB: > { %s1666_s17 = sadd.s32 4294967295, %s1574_s16   ;;  %s1194_s18 = sadd.s32 4294967294, %s1574_s16   ;;  %s1574_s16 = sphi %s1651_s16, %s2116_s16   ;;  %s1570_s15 = sphi %s1649_s15, %s2115_s15   ;;  %s1566_s14 = sphi %s1647_s14, %s2114_s14   ;;  %s1562_s13 = sphi %s1645_s13, %s2113_s13  }
   0x6   : > { %s1670_s19 = sadd.s32 1, %s1574_s16   ;;  %s33_s20 = sadd.s32 1, %s1570_s15 }
   0x7   : > { %s30_s21 = ssub.s32 %s1574_s16, %s1670_s19  ;;  %p40_p0 = scmp.ne.s32.totalorder %s1570_s15, %s1566_s14 }
   0x8   : > { %p31_p1 = scmp.eq.s32.totalorder %s30_s21, 0  ;;  %p41_p2 = scmp.eq.s32.totalorder %s1574_s16, 0 }
   0x9   : > { %p46_p3 = scmp.ne.s32.totalorder %s1566_s14, %s1562_s13  ;;  %p47_p4 = scmp.eq.s32.totalorder %s1666_s17, 0 }
   0xa   : > { %s1682_s22 = scalar_select %p31_p1, %s1570_s15, %s33_s20  }
   0xb   : > { %p1684_p5 = por %p41_p2, %p40_p0  ;;  %p1688_p6 = por %p47_p4, %p46_p3 }
   0xc   : > { %2091 = sst [smem:[#allocation8_spill]] %s1682_s22  ;;  %p259_p7 = scmp.eq.s32.totalorder %s1666_s17, 1 }
   0xd   : > { %p265_p8 = scmp.eq.s32.totalorder %s1194_s18, 1  ;;  %p1382_p10 = scmp.lt.s32.totalorder %s1574_s16, 2 }
   0xe   : > { %p1695_p11 = por %p259_p7, %p40_p0  ;;  %s312_s27 = sand.u32 1, %s1570_s15  }
   0xf   : > { %p1699_p12 = por %p265_p8, %p46_p3  ;;  %s1267_s28 = sshll.u32 %s1574_s16, 8 }
  0x10   : > { %s2094_s25 = scalar_select %p1695_p11, 1, 0 }
  0x11   : > { %s2095_s26 = scalar_select %p1699_p12, 1, 0 }
  0x12   : > { %s1197_s29 = sshll.u32 %s312_s27, 4  ;;  %s1708_s12 = scalar_lea.hbm %s2079_s0, %s1267_s28 }
  0x13   : > { %s316_s18 = scalar_lea.vmem [#allocation2], %s1197_s29  ;;  %p1712_p13 = pnand %p1382_p10, %p1684_p5 }
  0x14   : > { %s323_s20 = sshll.u32 %s316_s18, 4  ;;  %s1718_s22 = scalar_lea.sflag [#allocation3], %s312_s27  ;;  %s1716_s20 = int_to_ptr.vmem [resolvable:$true] %s323_s20 }
  0x15   : > { %s1478_s30 = scalar_lea.hbm %s1708_s12, 256  ;;  %p1480_p1 = pneg %p1712_p13 }
  0x16   : > { %p1479_p0 = scmp.ne.s32.totalorder %s1708_s12, %s1478_s30  ;;  %s1483_s29 = scalar_lea.hbm %s2079_s0, 512 }
  0x17   : > { %p1484_p4 = scmp.lt.u32.totalorder %s1708_s12, %s2079_s0  ;;  %p1485_p5 = scmp.lt.u32.totalorder %s1483_s29, %s1478_s30 }
  0x18   : > { %p1481_p2 = pnand %p1480_p1, %p1479_p0  ;;  %p1487_p8 = scmp.lt.u32.totalorder %s1478_s30, %s1708_s12 }
  0x19   : > { %p1486_p7 = por %p1485_p5, %p1484_p4 }
  0x1a   : > { %p1482_p3 = pneg %p1481_p2 }
  0x1b   : > { %p1488_p10 = por %p1487_p8, %p1486_p7 }
  0x1d   : > { %p1489_p9 = pnand %p1488_p10, %p1482_p3 }
  0x1f   : > { %1492 = shalt.err (!%p1489_p9)
}
  0x20   : > { %s1493_s27 = scalar_lea.vmem %s1716_s20, 256  ;;  %s1576_s28 = smov [#allocation2]  }
  0x21   : > { %p1494_p0 = scmp.ne.s32.totalorder %s1716_s20, %s1493_s27  ;;  %s1498_s23 = sshll.u32 %s1576_s28, 4  ;;  %s1499_s23 = int_to_ptr.vmem [resolvable:$false] %s1498_s23 }
  0x22   : > { %s1500_s11 = scalar_lea.vmem %s1499_s23, 512  ;;  %p1501_p11 = scmp.lt.s32.totalorder %s1716_s20, %s1499_s23 }
  0x23   : > { %p1496_p2 = pnand %p1494_p0, %p1480_p1  ;;  %p1502_p4 = scmp.lt.s32.totalorder %s1500_s11, %s1493_s27 }
  0x25   : > { %p1497_p12 = pneg %p1496_p2  ;;  %p1503_p5 = por %p1502_p4, %p1501_p11 }
  0x27   : > { %p1504_p7 = pnand %p1503_p5, %p1497_p12 }
  0x29   : > { %1507 = shalt.err (!%p1504_p7)
}
  0x2a   : > { %s1577_s30 = smov 64   ;;  %s1578_s29 = smov 4  }
  0x2b   : > { %1377 = dma.hbm_to_vmem [thread:$0]  (!%p1712_p13), %s1708_s12, 256, %s1716_s20, %s1718_s22, %s1577_s30, %s1577_s30, %s1578_s29  }
  0x2c   : > { %p1200_p9 = scmp.ge.s32.totalorder %s1574_s16, 1  ;;  %p331_p1 = scmp.lt.s32.totalorder %s1574_s16, 3 }
  0x2e   : > { %p332_p3 = pnand %p1200_p9, %p331_p1 }
  0x2f   : > { %s1749_s18 = sand.u32 (!%p332_p3), 1, %s1566_s14  }
  0x30   : > { %335 = sbr.rel (%p332_p3) target bundleno = 5534 (0x159e), region = 60  ;;  %s1201_s27 = sshll.u32 (!%p332_p3), %s1749_s18, 4 }
  0x31   : > { %s338_s28 = scalar_lea.sflag (!%p332_p3), [#allocation3], %s1749_s18  ;;  %s341_s23 = scalar_lea.vmem (!%p332_p3), [#allocation2], %s1201_s27 }
  0x37   : > { %1553 = dma.done.wait (%p1688_p6), %s338_s28, 256  }
  0x38   : > { %1555 = vsyncadd (%p1688_p6), %s338_s28, 4294967040  ;;  %v1579_v0 = vmov 0.0   ;;  %vm1580_vm0 = vmmov 0   ;;  %v397_v1 = vld [vmem:[%s341_s23] sm:$0xf]  ;;  %vm414_vm1 = vcmask 1041408   ;;  %v379_v20 = vlaneseq }
  0x39   : > { %1298 = vmatprep.subr.bf16.mxu0 %v1579_v0  ;;  %1300 = vmatprep.mubr.msk.bf16.mxu0 %vm1580_vm0, %v1579_v0  ;;  %v1203_v2 = vld [vmem:[%s341_s23 + $0x4] sm:$0xf]  ;;  %v1204_v3 = vld [vmem:[%s341_s23 + $0x8] sm:$0xf]  ;;  %v1205_v5 = vld [vmem:[%s341_s23 + $0xc] sm:$0xf] }
  0x3a   : > { %1304 = vmatprep.subr.bf16.mxu1 %v1579_v0  ;;  %1314 = vmatprep.mubr.msk.bf16.mxu1 %vm1580_vm0, %v1579_v0  ;;  %v400_v4 = vadd.f32 %v1203_v2, %v397_v1  ;;  %v408_v11 = vld [vmem:[%s2080_s1] sm:$0xf]  ;;  %vm410_vm2 = vcmask 31744   ;;  %s1581_s12 = smov 64   ;;  %vm458_vm3 = vcmask 1048064   ;;  %s1582_s20 = smov 65  }
  0x3b   : > { %s1583_s21 = smov 127   ;;  %v1781_v21 = vand.u32 127, %v379_v20  ;;  %s1584_s11 = smov 72   ;;  %vm1586_vm10 = vmmov 1   ;;  %vm522_vm13 = vcmask 1043456   ;;  %vm518_vm14 = vcmask 588800  }
  0x3c   : > { %v403_v6 = vadd.f32 %v1204_v3, %v400_v4  ;;  %s1585_s30 = smov 120   ;;  %v512_v57 = vld [vmem:[%s2081_s2] sm:$0xf]  ;;  %vm672_vm15 = vcmask 523264   ;;  %s1587_s29 = smov 1  }
  0x3d   : > { %v385_v22 = vand.u32 7, %v1781_v21  ;;  %vm395_vm6 = vcmp.ge.s32.totalorder %v1781_v21, 8  ;;  %vm396_vm9 = vcmp.lt.s32.totalorder %v1781_v21, 56  ;;  %v945_v21 = vld [vmem:[%s2086_s7] sm:$0xf]  ;;  %s1264_s28 = sshll.u32 %s1666_s17, 7 }
  0x3e   : > { %v406_v7 = vadd.f32 %v1205_v5, %v403_v6  ;;  %vm1809_vm7 = vmpackc.low %vm395_vm6, %vm395_vm6  ;;  %p2109_p11 = scmp.ne.s32.totalorder %s2094_s25, 0  ;;  %s1589_s17 = smov [#allocation5]  }
  0x3f   : > { %vm1784_vm4 = vcmp.gt.s32.totalorder %v385_v22, 0  ;;  %vm1791_vm5 = vcmp.lt.s32.totalorder %v385_v22, 7  ;;  %vm1841_vm12 = vmpackc.low %vm396_vm9, %vm396_vm9  ;;  %s1512_s24 = sshll.u32 %s1589_s17, 4  ;;  %s1513_s24 = int_to_ptr.vmem [resolvable:$false] %s1512_s24 }
  0x40   : > { %v407_v8 = vmul.f32 0.25, %v406_v7  ;;  %vm1818_vm8 = vmpackc.low %vm1784_vm4, %vm395_vm6  ;;  %s1514_s27 = scalar_lea.vmem %s1513_s24, 256 }
  0x41   : > { %vm1828_vm11 = vmpackc.low %vm1791_vm5, %vm1586_vm10 }
  0x42   : > { %v409_v9 = vpack.c.bf16 %v407_v8, %v407_v8 }
  0x44   : > { %v416_v10 = vsel %vm414_vm1, %v409_v9, 0  ;;  %vm677_vm1 = vcmask 64512  }
  0x45   : > { %1299 = vmatpush3.bf16.msra.mxu0 %v416_v10 }
  0x46   : > { %1318 = vmatprep.subr.bf16.mxu0 %v1579_v0 }
  0x48   : > { %1301 = vmatmul.mubr.msk.bf16.vlgmr.msra.gmra.mrb[0].mxu0 %vm410_vm2, %v408_v11 }
  0x49   : > { %1328 = vmatprep.mubr.msk.bf16.mxu0 %vm1580_vm0, %v1579_v0 }
 0x11b   : > { %v1769_v12 = vpop.f32.mrb[0].mxu0 }
 0x11c   : > { %459 = vrot.lane.b32.xlu0 %v1769_v12, %s1581_s12  ;;  %v1302_v13 = vpop.f32.mrb[1].mxu0 }
 0x11d   : > { %v455_v14 = vpop.f32.mrb[2].mxu0 }
 0x11e   : > { %v1303_v15 = vpop.f32.mrb[3].mxu0 }
 0x18e   : > { %v460_v16 = vpop.permute.xlu0 %459 }
 0x18f   : > { %v461_v17 = vsel %vm458_vm3, %v460_v16, %v1769_v12 }
 0x190   : > { %462 = vrot.lane.b32.xlu0 %v461_v17, %s1581_s12 }
 0x202   : > { %v463_v18 = vpop.permute.xlu0 %462 }
 0x203   : > { %v464_v19 = vsel %vm458_vm3, %v463_v18, %v1769_v12 }
 0x204   : > { %466 = vrot.lane.b32.xlu1 %v464_v19, %s1582_s20 }
 0x208   : > { %470 = vrot.lane.b32.xlu1 %v464_v19, %s1583_s21 }
 0x276   : > { %v467_v24 = vpop.permute.xlu1 %466 }
 0x277   : > { %v469_v25 = vsel %vm1784_vm4, %v467_v24, 0.0 }
 0x278   : > { %474 = vrot.lane.b32.xlu0 %v469_v25, %s1581_s12 }
 0x27a   : > { %v471_v27 = vpop.permute.xlu1 %470 }
 0x27b   : > { %v473_v28 = vsel %vm1791_vm5, %v471_v27, 0.0  ;;  %v1214_v49 = vpack.c.bf16 %v471_v27, %v1769_v12 }
 0x27c   : > { %477 = vrot.lane.b32.xlu1 %v473_v28, %s1581_s12 }
 0x2ea   : > { %v475_v29 = vpop.permute.xlu0 %474 }
 0x2eb   : > { %v476_v30 = vsel %vm458_vm3, %v475_v29, %v469_v25 }
 0x2ec   : > { %480 = vrot.lane.b32.xlu0 %v476_v30, %s1581_s12 }
 0x2ee   : > { %v478_v31 = vpop.permute.xlu1 %477 }
 0x2ef   : > { %v479_v32 = vsel %vm458_vm3, %v478_v31, %v473_v28 }
 0x2f0   : > { %482 = vrot.lane.b32.xlu1 %v479_v32, %s1581_s12 }
 0x35e   : > { %v481_v33 = vpop.permute.xlu0 %480 }
 0x35f   : > { %v484_v34 = vsel %vm458_vm3, %v481_v33, %v469_v25 }
 0x360   : > { %v1428_v35 = vpack.i.bf16 %v464_v19, %v484_v34 }
 0x362   : > { %1429 = vrot.lane.b32.xlu0 %v1428_v35, %s1584_s11  ;;  %v483_v36 = vpop.permute.xlu1 %482 }
 0x363   : > { %v485_v37 = vsel %vm458_vm3, %v483_v36, %v473_v28 }
 0x364   : > { %492 = vrot.lane.b32.xlu1 %v485_v37, %s1584_s11 }
 0x366   : > { %1434 = vrot.lane.b32.xlu0 %v1428_v35, %s1585_s30 }
 0x368   : > { %504 = vrot.lane.b32.xlu1 %v485_v37, %s1585_s30  ;;  %v620_v37 = vld [vmem:[%s2082_s3] sm:$0xf] }
 0x3d4   : > { %v1430_v38 = vpop.permute.xlu0 %1429 }
 0x3d5   : > { %v1432_v39 = vunpack.i.h.bf16 %v1430_v38  ;;  %v1431_v40 = vunpack.i.l.bf16 %v1430_v38 }
 0x3d6   : > { %v493_v43 = vpop.permute.xlu1 %492 }
 0x3d7   : > { %v1208_v42 = vpack.c.bf16 %v1432_v39, %v1431_v40  ;;  %v1211_v45 = vpack.c.bf16 %v467_v24, %v493_v43 }
 0x3d8   : > { %v1435_v46 = vpop.permute.xlu0 %1434 }
 0x3d9   : > { %1305 = vmatpush3.bf16.msk.msra.mxu1 %vm1809_vm7, %v1208_v42  ;;  %v1437_v50 = vunpack.i.h.bf16 %v1435_v46  ;;  %v1436_v51 = vunpack.i.l.bf16 %v1435_v46 }
 0x3da   : > { %1306 = vmatprep.subr.bf16.mxu1 %v1579_v0  ;;  %v505_v47 = vpop.permute.xlu1 %504 }
 0x3db   : > { %v511_v52 = vsel %vm396_vm9, %v505_v47, 0.0  ;;  %v1217_v54 = vpack.c.bf16 %v1437_v50, %v1436_v51  ;;  %v1909_v47 = vshrl.u32 %v379_v20, 7  ;;  %v1588_v20 = vmov 0  }
 0x3dc   : > { %v517_v55 = vpack.c.bf16 %v511_v52, %v511_v52  ;;  %1448 = vset.pattern.permute.xlu1 %v1588_v20  ;;  %1469 = vset.pattern.permute.xlu0 %v1588_v20 }
 0x3dd   : > { %1307 = vmatpush3.bf16.msk.msra.mxu1 %vm1818_vm8, %v1211_v45  ;;  %v676_v45 = vld [vmem:[%s2083_s4] sm:$0x3] }
 0x3de   : > { %1308 = vmatprep.subr.bf16.mxu1 %v1579_v0  ;;  %v524_v56 = vsel %vm522_vm13, %v517_v55, 0  ;;  %v752_v55 = vld [vmem:[%s2084_s5] sm:$0xff] }
 0x3e1   : > { %1309 = vmatpush3.bf16.msk.msra.mxu1 %vm1828_vm11, %v1214_v49  ;;  %v761_v49 = vsub.s32 1, %v1909_v47 }
 0x3e2   : > { %1310 = vmatprep.subr.bf16.mxu1 %v1579_v0 }
 0x3e5   : > { %1311 = vmatpush3.bf16.msk.msra.mxu1 %vm1841_vm12, %v1217_v54 }
 0x3e6   : > { %1312 = vmatprep.subr.bf16.mxu1 %v1579_v0 }
 0x3e9   : > { %1313 = vmatpush3.bf16.msra.mxu1 %v524_v56 }
 0x3ea   : > { %1332 = vmatprep.subr.mxu1 %v1579_v0 }
 0x3ec   : > { %1315 = vmatmul.mubr.msk.bf16.vlgmr.msra.gmra.mrb[0].mxu1 %vm518_vm14, %v512_v57 }
 0x3ed   : > { %1334 = vmatprep.mubr.msk.f32.mxu1 %vm1580_vm0, %v1579_v0 }
 0x4bf   : > { %v560_v58 = vpop.f32.mrb[0].mxu1 }
 0x4c0   : > { %v566_v59 = vmax.f32 %v560_v58, 0.0  ;;  %v1316_v60 = vpop.f32.mrb[1].mxu1  ;;  %v755_v58 = vsub.s32 0, %v1909_v47 }
 0x4c1   : > { %v563_v61 = vpop.f32.mrb[2].mxu1 }
 0x4c2   : > { %567 = vrot.lane.b32.xlu0 %v566_v59, %s1581_s12  ;;  %v1317_v62 = vpop.f32.mrb[3].mxu1 }
 0x534   : > { %v568_v63 = vpop.permute.xlu0 %567 }
 0x535   : > { %v569_v1 = vsel %vm458_vm3, %v568_v63, %v566_v59 }
 0x536   : > { %570 = vrot.lane.b32.xlu1 %v569_v1, %s1581_s12 }
 0x5a8   : > { %v571_v2 = vpop.permute.xlu1 %570 }
 0x5a9   : > { %v572_v3 = vsel %vm458_vm3, %v571_v2, %v566_v59 }
 0x5aa   : > { %578 = vrot.lane.b32.xlu1 %v572_v3, %s1583_s21  ;;  %574 = vrot.lane.b32.xlu0 %v572_v3, %s1582_s20 }
 0x61c   : > { %v579_v4 = vpop.permute.xlu1 %578  ;;  %v575_v5 = vpop.permute.xlu0 %574 }
 0x61d   : > { %v581_v6 = vsel %vm1791_vm5, %v579_v4, 0.0  ;;  %v577_v7 = vsel %vm1784_vm4, %v575_v5, 0.0  ;;  %v1227_v30 = vpack.c.bf16 %v579_v4, %v566_v59 }
 0x61e   : > { %585 = vrot.lane.b32.xlu1 %v581_v6, %s1581_s12  ;;  %582 = vrot.lane.b32.xlu0 %v577_v7, %s1581_s12 }
 0x690   : > { %v586_v8 = vpop.permute.xlu1 %585  ;;  %v583_v9 = vpop.permute.xlu0 %582 }
 0x691   : > { %v587_v10 = vsel %vm458_vm3, %v586_v8, %v581_v6  ;;  %v584_v11 = vsel %vm458_vm3, %v583_v9, %v577_v7 }
 0x692   : > { %590 = vrot.lane.b32.xlu1 %v587_v10, %s1581_s12  ;;  %588 = vrot.lane.b32.xlu0 %v584_v11, %s1581_s12 }
 0x704   : > { %v591_v13 = vpop.permute.xlu1 %590  ;;  %v589_v14 = vpop.permute.xlu0 %588 }
 0x705   : > { %v592_v15 = vsel %vm458_vm3, %v589_v14, %v577_v7  ;;  %v593_v16 = vsel %vm458_vm3, %v591_v13, %v581_v6 }
 0x706   : > { %v1438_v17 = vpack.i.bf16 %v572_v3, %v592_v15  ;;  %600 = vrot.lane.b32.xlu1 %v593_v16, %s1584_s11 }
 0x708   : > { %1439 = vrot.lane.b32.xlu0 %v1438_v17, %s1584_s11 }
 0x70a   : > { %612 = vrot.lane.b32.xlu1 %v593_v16, %s1585_s30 }
 0x70c   : > { %1444 = vrot.lane.b32.xlu0 %v1438_v17, %s1585_s30 }
 0x778   : > { %v601_v25 = vpop.permute.xlu1 %600 }
 0x779   : > { %v1224_v27 = vpack.c.bf16 %v575_v5, %v601_v25 }
 0x77a   : > { %v1440_v18 = vpop.permute.xlu0 %1439 }
 0x77b   : > { %v1442_v19 = vunpack.i.h.bf16 %v1440_v18  ;;  %v1441_v22 = vunpack.i.l.bf16 %v1440_v18 }
 0x77c   : > { %v613_v29 = vpop.permute.xlu1 %612 }
 0x77d   : > { %v1221_v24 = vpack.c.bf16 %v1442_v19, %v1441_v22  ;;  %v619_v33 = vsel %vm396_vm9, %v613_v29, 0.0 }
 0x77e   : > { %v1445_v28 = vpop.permute.xlu0 %1444  ;;  %v625_v35 = vpack.c.bf16 %v619_v33, %v619_v33 }
 0x77f   : > { %1319 = vmatpush3.bf16.msk.msra.mxu0 %vm1809_vm7, %v1221_v24  ;;  %v1447_v31 = vunpack.i.h.bf16 %v1445_v28  ;;  %v1446_v32 = vunpack.i.l.bf16 %v1445_v28 }
 0x780   : > { %1320 = vmatprep.subr.bf16.mxu0 %v1579_v0  ;;  %v630_v36 = vsel %vm522_vm13, %v625_v35, 0 }
 0x781   : > { %v1230_v34 = vpack.c.bf16 %v1447_v31, %v1446_v32 }
 0x783   : > { %1321 = vmatpush3.bf16.msk.msra.mxu0 %vm1818_vm8, %v1224_v27 }
 0x784   : > { %1322 = vmatprep.subr.bf16.mxu0 %v1579_v0 }
 0x787   : > { %1323 = vmatpush3.bf16.msk.msra.mxu0 %vm1828_vm11, %v1227_v30 }
 0x788   : > { %1324 = vmatprep.subr.bf16.mxu0 %v1579_v0 }
 0x78b   : > { %1325 = vmatpush3.bf16.msk.msra.mxu0 %vm1841_vm12, %v1230_v34 }
 0x78c   : > { %1326 = vmatprep.subr.bf16.mxu0 %v1579_v0 }
 0x78f   : > { %1327 = vmatpush3.bf16.msra.mxu0 %v630_v36 }
 0x790   : > { %1337 = vmatprep.subr.bf16.mxu0 %v1579_v0 }
 0x792   : > { %1329 = vmatmul.mubr.msk.bf16.vlgmr.msra.gmra.mrb[4].mxu0 %vm518_vm14, %v620_v37 }
 0x793   : > { %1347 = vmatprep.mubr.msk.bf16.mxu0 %vm1580_vm0, %v1579_v0 }
 0x865   : > { %v666_v38 = vpop.f32.mrb[4].mxu0 }
 0x866   : > { %v1330_v39 = vpop.f32.mrb[5].mxu0  ;;  %v673_v40 = vsel %vm672_vm15, %v666_v38, 0.0 }
 0x867   : > { %674 = vadd.xlane.f32.xlu0 %v673_v40  ;;  %v669_v42 = vpop.f32.mrb[6].mxu0 }
 0x868   : > { %v1331_v43 = vpop.f32.mrb[7].mxu0 }
 0x8f4   : > { %v675_v46 = vpop.xlane.xlu0 %674 }
 0x8f5   : > { %1333 = vmatpush3.msra.mxu1 %v675_v46 }
 0x8f6   : > { %1335 = vmatmul.mubr.msk.f32.vlgmr.msra.gmra.mrb[4].mxu1 %vm677_vm1, %v676_v45  ;;  %1351 = vmatprep.subr.bf16.mxu1 %v1579_v0  ;;  %v839_v45 = vld [vmem:[%s2085_s6] sm:$0xf] }
 0x8f7   : > { %1361 = vmatprep.mubr.msk.bf16.mxu1 %vm1580_vm0, %v1579_v0 }
 0x9c9   : > { %v747_v50 = vpop.f32.mrb[4].mxu1 }
 0x9ca   : > { %v751_v51 = vmax.f32 %v747_v50, 0.0  ;;  %v1336_v52 = vpop.f32.mrb[5].mxu1 }
 0x9cc   : > { %v762_v54 = vrot.slane %v751_v51, %v761_v49  ;;  %v756_v59 = vrot.slane %v751_v51, %v755_v58 }
 0x9ce   : > { %764 = vrot.lane.b32.xlu1 %v762_v54, %s1587_s29  ;;  %v757_v60 = vmul.f32 %v756_v59, %v752_v55 }
 0xa40   : > { %v765_v56 = vpop.permute.xlu1 %764 }
 0xa41   : > { %v767_v57 = vmul.f32 %v765_v56, %v752_v55 }
 0xa43   : > { %769 = vrot.lane.b32.xlu1 %v767_v57, %s1583_s21 }
 0xab5   : > { %v770_v61 = vpop.permute.xlu1 %769 }
 0xab6   : > { %v772_v62 = vadd.f32 %v770_v61, %v757_v60 }
 0xab8   : > { %v1234_v63 = vmul.f32 -1.442695, %v772_v62 }
 0xaba   : > { %1470 = vpow2.f32 %v1234_v63 }
 0xac4   : > { %v1471_v1 = vpop.eup %1470 }
 0xac5   : > { %v776_v2 = vadd.f32 1.0, %v1471_v1 }
 0xac7   : > { %1472 = vrcp.f32 %v776_v2 }
 0xad1   : > { %v1473_v3 = vpop.eup %1472 }
 0xad2   : > { %781 = vperm.xlu1 %1448, %v1473_v3  }
 0xb51   : > { %v782_v4 = vpop.permute.xlu1 %781 }
 0xb52   : > { %v784_v5 = vmul.f32 %v782_v4, %v666_v38 }
 0xb54   : > { %v1923_v6 = vadd.f32 %v784_v5, %v1769_v12 }
 0xb56   : > { %786 = vrot.lane.b32.xlu1 %v1923_v6, %s1581_s12 }
 0xbc8   : > { %v787_v7 = vpop.permute.xlu1 %786 }
 0xbc9   : > { %v788_v8 = vsel %vm458_vm3, %v787_v7, %v1923_v6 }
 0xbca   : > { %789 = vrot.lane.b32.xlu1 %v788_v8, %s1581_s12 }
 0xc3c   : > { %v790_v9 = vpop.permute.xlu1 %789 }
 0xc3d   : > { %v791_v10 = vsel %vm458_vm3, %v790_v9, %v1923_v6 }
 0xc3e   : > { %793 = vrot.lane.b32.xlu1 %v791_v10, %s1582_s20 }
 0xc42   : > { %797 = vrot.lane.b32.xlu1 %v791_v10, %s1583_s21 }
 0xcb0   : > { %v794_v11 = vpop.permute.xlu1 %793 }
 0xcb1   : > { %v796_v12 = vsel %vm1784_vm4, %v794_v11, 0.0 }
 0xcb2   : > { %801 = vrot.lane.b32.xlu1 %v796_v12, %s1581_s12 }
 0xcb4   : > { %v798_v13 = vpop.permute.xlu1 %797 }
 0xcb5   : > { %v800_v14 = vsel %vm1791_vm5, %v798_v13, 0.0  ;;  %v1242_v35 = vpack.c.bf16 %v798_v13, %v1923_v6 }
 0xcb6   : > { %804 = vrot.lane.b32.xlu0 %v800_v14, %s1581_s12 }
 0xd24   : > { %v802_v15 = vpop.permute.xlu1 %801 }
 0xd25   : > { %v803_v16 = vsel %vm458_vm3, %v802_v15, %v796_v12 }
 0xd26   : > { %807 = vrot.lane.b32.xlu1 %v803_v16, %s1581_s12 }
 0xd28   : > { %v805_v17 = vpop.permute.xlu0 %804 }
 0xd29   : > { %v806_v18 = vsel %vm458_vm3, %v805_v17, %v800_v14 }
 0xd2a   : > { %809 = vrot.lane.b32.xlu1 %v806_v18, %s1581_s12 }
 0xd98   : > { %v808_v19 = vpop.permute.xlu1 %807 }
 0xd99   : > { %v811_v22 = vsel %vm458_vm3, %v808_v19, %v796_v12 }
 0xd9a   : > { %v1449_v24 = vpack.i.bf16 %v791_v10, %v811_v22 }
 0xd9c   : > { %1450 = vrot.lane.b32.xlu1 %v1449_v24, %s1584_s11  ;;  %v810_v25 = vpop.permute.xlu1 %809 }
 0xd9d   : > { %v812_v27 = vsel %vm458_vm3, %v810_v25, %v800_v14 }
 0xda0   : > { %819 = vrot.lane.b32.xlu1 %v812_v27, %s1584_s11 }
 0xda4   : > { %1455 = vrot.lane.b32.xlu1 %v1449_v24, %s1585_s30 }
 0xda8   : > { %831 = vrot.lane.b32.xlu1 %v812_v27, %s1585_s30 }
 0xe0e   : > { %v1451_v28 = vpop.permute.xlu1 %1450 }
 0xe0f   : > { %v1453_v29 = vunpack.i.h.bf16 %v1451_v28  ;;  %v1452_v30 = vunpack.i.l.bf16 %v1451_v28 }
 0xe11   : > { %v1236_v31 = vpack.c.bf16 %v1453_v29, %v1452_v30 }
 0xe12   : > { %v820_v32 = vpop.permute.xlu1 %819 }
 0xe13   : > { %1338 = vmatpush3.bf16.msk.msra.mxu0 %vm1809_vm7, %v1236_v31  ;;  %v1239_v33 = vpack.c.bf16 %v794_v11, %v820_v32 }
 0xe14   : > { %1339 = vmatprep.subr.bf16.mxu0 %v1579_v0 }
 0xe16   : > { %v1456_v34 = vpop.permute.xlu1 %1455 }
 0xe17   : > { %1340 = vmatpush3.bf16.msk.msra.mxu0 %vm1818_vm8, %v1239_v33  ;;  %v1458_v36 = vunpack.i.h.bf16 %v1456_v34  ;;  %v1457_v37 = vunpack.i.l.bf16 %v1456_v34  ;;  %v1075_v33 = vld [vmem:[%s2088_s9] sm:$0xff] }
 0xe18   : > { %1341 = vmatprep.subr.bf16.mxu0 %v1579_v0 }
 0xe19   : > { %v1245_v40 = vpack.c.bf16 %v1458_v36, %v1457_v37 }
 0xe1a   : > { %v832_v38 = vpop.permute.xlu1 %831 }
 0xe1b   : > { %v838_v39 = vsel %vm396_vm9, %v832_v38, 0.0  ;;  %1342 = vmatpush3.bf16.msk.msra.mxu0 %vm1828_vm11, %v1242_v35 }
 0xe1c   : > { %1343 = vmatprep.subr.bf16.mxu0 %v1579_v0  ;;  %v844_v42 = vpack.c.bf16 %v838_v39, %v838_v39 }
 0xe1e   : > { %v849_v43 = vsel %vm522_vm13, %v844_v42, 0 }
 0xe1f   : > { %1344 = vmatpush3.bf16.msk.msra.mxu0 %vm1841_vm12, %v1245_v40 }
 0xe20   : > { %1345 = vmatprep.subr.bf16.mxu0 %v1579_v0 }
 0xe23   : > { %1346 = vmatpush3.bf16.msra.mxu0 %v849_v43 }
 0xe24   : > { %1365 = vmatprep.subr.mxu0 %v1579_v0 }
 0xe26   : > { %1348 = vmatmul.mubr.msk.bf16.vlgmr.msra.gmra.mrb[8].mxu0 %vm518_vm14, %v839_v45 }
 0xe27   : > { %1367 = vmatprep.mubr.msk.f32.mxu0 %vm1580_vm0, %v1579_v0 }
 0xef9   : > { %v885_v46 = vpop.f32.mrb[8].mxu0 }
 0xefa   : > { %v891_v50 = vmax.f32 %v885_v46, 0.0  ;;  %v1349_v51 = vpop.f32.mrb[9].mxu0 }
 0xefb   : > { %v888_v52 = vpop.f32.mrb[10].mxu0 }
 0xefc   : > { %892 = vrot.lane.b32.xlu0 %v891_v50, %s1581_s12  ;;  %v1350_v54 = vpop.f32.mrb[11].mxu0 }
 0xf6e   : > { %v893_v55 = vpop.permute.xlu0 %892 }
 0xf6f   : > { %v894_v56 = vsel %vm458_vm3, %v893_v55, %v891_v50 }
 0xf70   : > { %895 = vrot.lane.b32.xlu1 %v894_v56, %s1581_s12 }
 0xfe2   : > { %v896_v57 = vpop.permute.xlu1 %895 }
 0xfe3   : > { %v897_v20 = vsel %vm458_vm3, %v896_v57, %v891_v50 }
 0xfe4   : > { %903 = vrot.lane.b32.xlu1 %v897_v20, %s1583_s21  ;;  %899 = vrot.lane.b32.xlu0 %v897_v20, %s1582_s20  ;;  %s2034_s20 = scalar_lea.hbm %s2089_s10, %s1264_s28 }
0x1056   : > { %v904_v59 = vpop.permute.xlu1 %903  ;;  %v900_v60 = vpop.permute.xlu0 %899 }
0x1057   : > { %v906_v61 = vsel %vm1791_vm5, %v904_v59, 0.0  ;;  %v902_v62 = vsel %vm1784_vm4, %v900_v60, 0.0  ;;  %v1255_v16 = vpack.c.bf16 %v904_v59, %v891_v50 }
0x1058   : > { %910 = vrot.lane.b32.xlu1 %v906_v61, %s1581_s12  ;;  %907 = vrot.lane.b32.xlu0 %v902_v62, %s1581_s12 }
0x10ca   : > { %v911_v63 = vpop.permute.xlu1 %910  ;;  %v908_v1 = vpop.permute.xlu0 %907 }
0x10cb   : > { %v912_v2 = vsel %vm458_vm3, %v911_v63, %v906_v61  ;;  %v909_v3 = vsel %vm458_vm3, %v908_v1, %v902_v62 }
0x10cc   : > { %915 = vrot.lane.b32.xlu1 %v912_v2, %s1581_s12  ;;  %913 = vrot.lane.b32.xlu0 %v909_v3, %s1581_s12 }
0x113e   : > { %v916_v4 = vpop.permute.xlu1 %915  ;;  %v914_v26 = vpop.permute.xlu0 %913 }
0x113f   : > { %v917_v5 = vsel %vm458_vm3, %v914_v26, %v902_v62  ;;  %v918_v23 = vsel %vm458_vm3, %v916_v4, %v906_v61 }
0x1140   : > { %v1459_v7 = vpack.i.bf16 %v897_v20, %v917_v5  ;;  %925 = vrot.lane.b32.xlu1 %v918_v23, %s1584_s11 }
0x1142   : > { %1460 = vrot.lane.b32.xlu0 %v1459_v7, %s1584_s11  ;;  %s1111_s11 = scalar_lea.sflag [#allocation4], %s1749_s18 }
0x1144   : > { %937 = vrot.lane.b32.xlu1 %v918_v23, %s1585_s30 }
0x1146   : > { %1465 = vrot.lane.b32.xlu0 %v1459_v7, %s1585_s30 }
0x11b2   : > { %v926_v12 = vpop.permute.xlu1 %925 }
0x11b3   : > { %v1252_v13 = vpack.c.bf16 %v900_v60, %v926_v12 }
0x11b4   : > { %v1461_v8 = vpop.permute.xlu0 %1460 }
0x11b5   : > { %v1463_v9 = vunpack.i.h.bf16 %v1461_v8  ;;  %v1462_v10 = vunpack.i.l.bf16 %v1461_v8 }
0x11b6   : > { %v938_v15 = vpop.permute.xlu1 %937 }
0x11b7   : > { %v1249_v11 = vpack.c.bf16 %v1463_v9, %v1462_v10  ;;  %v944_v19 = vsel %vm396_vm9, %v938_v15, 0.0 }
0x11b8   : > { %v1466_v14 = vpop.permute.xlu0 %1465  ;;  %v950_v22 = vpack.c.bf16 %v944_v19, %v944_v19 }
0x11b9   : > { %1352 = vmatpush3.bf16.msk.msra.mxu1 %vm1809_vm7, %v1249_v11  ;;  %v1468_v17 = vunpack.i.h.bf16 %v1466_v14  ;;  %v1467_v18 = vunpack.i.l.bf16 %v1466_v14 }
0x11ba   : > { %1353 = vmatprep.subr.bf16.mxu1 %v1579_v0  ;;  %v955_v44 = vsel %vm522_vm13, %v950_v22, 0 }
0x11bb   : > { %v1258_v41 = vpack.c.bf16 %v1468_v17, %v1467_v18 }
0x11bd   : > { %1354 = vmatpush3.bf16.msk.msra.mxu1 %vm1818_vm8, %v1252_v13 }
0x11be   : > { %1355 = vmatprep.subr.bf16.mxu1 %v1579_v0 }
0x11c1   : > { %1356 = vmatpush3.bf16.msk.msra.mxu1 %vm1828_vm11, %v1255_v16 }
0x11c2   : > { %1357 = vmatprep.subr.bf16.mxu1 %v1579_v0 }
0x11c5   : > { %1358 = vmatpush3.bf16.msk.msra.mxu1 %vm1841_vm12, %v1258_v41 }
0x11c6   : > { %1359 = vmatprep.subr.bf16.mxu1 %v1579_v0  ;;  %v1000_v0 = vld [vmem:[%s2087_s8] sm:$0x3] }
0x11c9   : > { %1360 = vmatpush3.bf16.msra.mxu1 %v955_v44 }
0x11cc   : > { %1362 = vmatmul.mubr.msk.bf16.vlgmr.msra.gmra.mrb[8].mxu1 %vm518_vm14, %v945_v21 }
0x129f   : > { %v991_v48 = vpop.f32.mrb[8].mxu1 }
0x12a0   : > { %v1363_v24 = vpop.f32.mrb[9].mxu1  ;;  %v997_v25 = vsel %vm672_vm15, %v991_v48, 0.0 }
0x12a1   : > { %998 = vadd.xlane.f32.xlu0 %v997_v25  ;;  %v994_v27 = vpop.f32.mrb[10].mxu1 }
0x12a2   : > { %v1364_v28 = vpop.f32.mrb[11].mxu1 }
0x132e   : > { %v999_v53 = vpop.xlane.xlu0 %998 }
0x132f   : > { %1366 = vmatpush3.msra.mxu0 %v999_v53 }
0x1330   : > { %1368 = vmatmul.mubr.msk.f32.vlgmr.msra.gmra.mrb[12].mxu0 %vm677_vm1, %v1000_v0 }
0x1403   : > { %v1070_v29 = vpop.f32.mrb[12].mxu0 }
0x1404   : > { %v1074_v30 = vmax.f32 %v1070_v29, 0.0  ;;  %v1369_v31 = vpop.f32.mrb[13].mxu0 }
0x1406   : > { %v1085_v32 = vrot.slane %v1074_v30, %v761_v49  ;;  %v1079_v36 = vrot.slane %v1074_v30, %v755_v58 }
0x1408   : > { %1087 = vrot.lane.b32.xlu1 %v1085_v32, %s1587_s29  ;;  %v1080_v37 = vmul.f32 %v1079_v36, %v1075_v33  ;;  %s1202_s29 = sshll.u32 %s1749_s18, 3 }
0x1409   : > { %s377_s23 = scalar_lea.vmem [#allocation5], %s1202_s29 }
0x147a   : > { %v1088_v34 = vpop.permute.xlu1 %1087 }
0x147b   : > { %v1090_v35 = vmul.f32 %v1088_v34, %v1075_v33 }
0x147d   : > { %1092 = vrot.lane.b32.xlu1 %v1090_v35, %s1583_s21  ;;  %s1124_s21 = sshll.u32 %s377_s23, 4  ;;  %s2036_s21 = int_to_ptr.vmem [resolvable:$true] %s1124_s21 }
0x147e   : > { %s1508_s30 = scalar_lea.vmem %s2036_s21, 128  ;;  %p1515_p8 = scmp.lt.s32.totalorder %s2036_s21, %s1513_s24 }
0x147f   : > { %p1509_p6 = scmp.ne.s32.totalorder %s2036_s21, %s1508_s30  ;;  %p1516_p10 = scmp.lt.s32.totalorder %s1514_s27, %s1508_s30 }
0x1481   : > { %p1510_p12 = pnand %p1509_p6, %p2109_p11  ;;  %p1517_p0 = por %p1516_p10, %p1515_p8 }
0x1483   : > { %p1511_p13 = pneg %p1510_p12 }
0x1485   : > { %p1518_p2 = pnand %p1517_p0, %p1511_p13 }
0x14ef   : > { %v1093_v38 = vpop.permute.xlu1 %1092 }
0x14f0   : > { %v1095_v39 = vadd.f32 %v1093_v38, %v1080_v37 }
0x14f2   : > { %v1262_v40 = vmul.f32 -1.442695, %v1095_v39 }
0x14f4   : > { %1474 = vpow2.f32 %v1262_v40 }
0x14fe   : > { %v1475_v49 = vpop.eup %1474 }
0x14ff   : > { %v1099_v42 = vadd.f32 1.0, %v1475_v49 }
0x1501   : > { %1476 = vrcp.f32 %v1099_v42 }
0x150b   : > { %v1477_v43 = vpop.eup %1476 }
0x150c   : > { %1104 = vperm.xlu1 %1448, %v1477_v43  }
0x158b   : > { %v1105_v45 = vpop.permute.xlu1 %1104 }
0x158c   : > { %v1107_v46 = vmul.f32 %v1105_v45, %v991_v48 }
0x158e   : > { %v1108_v47 = vadd.f32 %v1107_v46, %v1923_v6 }
0x1590   : > { %1109 = vst.msk [vmem:[%s377_s23] sm:$0xff] %vm672_vm15, %v1108_v47 }
0x1591   : > { %1521 = shalt.err (!%p1518_p2)
}
0x1592   : > { %s1522_s18 = scalar_lea.hbm %s2034_s20, 128  ;;  %s1526_s23 = scalar_lea.hbm %s2089_s10, 256 }
0x1593   : > { %p1523_p4 = scmp.ne.s32.totalorder %s2034_s20, %s1522_s18  ;;  %p1527_p9 = scmp.lt.u32.totalorder %s2034_s20, %s2089_s10 }
0x1594   : > { %p1528_p1 = scmp.lt.u32.totalorder %s1526_s23, %s1522_s18  ;;  %p1530_p6 = scmp.lt.u32.totalorder %s1522_s18, %s2034_s20 }
0x1595   : > { %p1524_p5 = pnand %p1523_p4, %p2109_p11 }
0x1596   : > { %p1529_p3 = por %p1528_p1, %p1527_p9 }
0x1597   : > { %p1525_p7 = pneg %p1524_p5 }
0x1598   : > { %p1531_p12 = por %p1530_p6, %p1529_p3 }
0x159a   : > { %p1532_p13 = pnand %p1531_p12, %p1525_p7 }
0x159c   : > { %1535 = shalt.err (!%p1532_p13)
}
0x159d   : > { %1372 = dma.vmem_to_hbm [thread:$0]  (%p2109_p11), %s2036_s21, 128, %s2034_s20, %s1111_s11  }
0x159e PF: > { %s1136_s30 = sand.u32 1, %s1562_s13   ;;  %p2110_p8 = scmp.ne.s32.totalorder %s2095_s26, 0 }
0x159f   : > { %p2111_p10 = scmp.ge.s32.totalorder %s1574_s16, 2  ;;  %s1137_s17 = scalar_lea.sflag [#allocation4], %s1136_s30 }
0x15a1   : > { %p1379_p0 = pnand %p2111_p10, %p2110_p8 }
0x15a3   : > { %1557 = dma.done.wait (!%p1379_p0), %s1137_s17, 128  }
0x15a4   : > { %1559 = vsyncadd (!%p1379_p0), %s1137_s17, 4294967168  ;;  %s2112_s24 = sld [smem:[#allocation8_spill]]  ;;  %p23_p2 = scmp.ge.s32.totalorder %s1670_s19, 4  }
0x15a5   : > { %s2113_s13 = smov %s1566_s14  ;;  %s2114_s14 = smov %s1570_s15 }
0x15a6   : > { %s2116_s16 = smov %s1670_s19  ;;  %25 = sbr.rel (!%p23_p2) target bundleno = 5 (0x5), region = 108 }
0x15aa   : > { %s2115_s15 = smov %s2112_s24 }
0x15ad   :  { %1142 = vsyncpa [#allocation3], 1 }
0x15ae   :  { %1144 = vsyncpa [#allocation3 + $0x1], 1 }
0x15af   :  { %1145 = vsyncpa [#allocation4], 1 }
0x15b0   :  { %1147 = vsyncpa [#allocation4 + $0x1], 1 }

// kernel: tpu_custom_call.1
= control target key start
LH: loop header
LB: loop body
LE: loop exit
PB: predicated region body
PF: predicated region fallthrough
CT: control target
= control target key end

     0   :  { %15 = vsyncpa [#allocation3], 0  ;;  %s2079_s0 = inlined_call_operand.hbm [shape: f32[2,4,4,64], index: 0, kind: input, shape index: {}]   ;;  %s2080_s1 = inlined_call_operand.vmem [shape: bf16[8,4], index: 1, kind: input, shape index: {}]   ;;  %s2081_s2 = inlined_call_operand.vmem [shape: bf16[8,72], index: 2, kind: input, shape index: {}]   ;;  %s2082_s3 = inlined_call_operand.vmem [shape: bf16[8,72], index: 3, kind: input, shape index: {}]   ;;  %s2083_s4 = inlined_call_operand.vmem [shape: f32[2,8], index: 4, kind: input, shape index: {}]   ;;  %s2084_s5 = inlined_call_operand.vmem [shape: f32[8,2], index: 5, kind: input, shape index: {}]   ;;  %s2085_s6 = inlined_call_operand.vmem [shape: bf16[8,72], index: 6, kind: input, shape index: {}]   ;;  %s2086_s7 = inlined_call_operand.vmem [shape: bf16[8,72], index: 7, kind: input, shape index: {}]   ;;  %s2087_s8 = inlined_call_operand.vmem [shape: f32[2,8], index: 8, kind: input, shape index: {}]   ;;  %s2088_s9 = inlined_call_operand.vmem [shape: f32[8,2], index: 9, kind: input, shape index: {}]   ;;  %s2089_s10 = inlined_call_operand.hbm [shape: f32[2,8,64], index: 10, kind: output, shape index: {}]  }
   0x1   :  { %17 = vsyncpa [#allocation3 + $0x1], 0 }
   0x2   :  { %18 = vsyncpa [#allocation4], 0 }
   0x3   :  { %20 = vsyncpa [#allocation4 + $0x1], 0  ;;  %s1645_s13 = smov 0   ;;  %s1647_s14 = smov 0  }
   0x4   :  { %s1649_s15 = smov 0   ;;  %s1651_s16 = smov 0  }
   0x5 LB: > { %s1666_s17 = sadd.s32 4294967295, %s1574_s16   ;;  %s1194_s18 = sadd.s32 4294967294, %s1574_s16   ;;  %s1574_s16 = sphi %s1651_s16, %s2116_s16   ;;  %s1570_s15 = sphi %s1649_s15, %s2115_s15   ;;  %s1566_s14 = sphi %s1647_s14, %s2114_s14   ;;  %s1562_s13 = sphi %s1645_s13, %s2113_s13  }
   0x6   : > { %s1670_s19 = sadd.s32 1, %s1574_s16   ;;  %s33_s20 = sadd.s32 1, %s1570_s15 }
   0x7   : > { %s30_s21 = ssub.s32 %s1574_s16, %s1670_s19  ;;  %p40_p0 = scmp.ne.s32.totalorder %s1570_s15, %s1566_s14 }
   0x8   : > { %p31_p1 = scmp.eq.s32.totalorder %s30_s21, 0  ;;  %p41_p2 = scmp.eq.s32.totalorder %s1574_s16, 0 }
   0x9   : > { %p46_p3 = scmp.ne.s32.totalorder %s1566_s14, %s1562_s13  ;;  %p47_p4 = scmp.eq.s32.totalorder %s1666_s17, 0 }
   0xa   : > { %s1682_s22 = scalar_select %p31_p1, %s1570_s15, %s33_s20  }
   0xb   : > { %p1684_p5 = por %p41_p2, %p40_p0  ;;  %p1688_p6 = por %p47_p4, %p46_p3 }
   0xc   : > { %2091 = sst [smem:[#allocation8_spill]] %s1682_s22  ;;  %p259_p7 = scmp.eq.s32.totalorder %s1666_s17, 1 }
   0xd   : > { %p265_p8 = scmp.eq.s32.totalorder %s1194_s18, 1  ;;  %p1382_p10 = scmp.lt.s32.totalorder %s1574_s16, 2 }
   0xe   : > { %p1695_p11 = por %p259_p7, %p40_p0  ;;  %s312_s27 = sand.u32 1, %s1570_s15  }
   0xf   : > { %p1699_p12 = por %p265_p8, %p46_p3  ;;  %s1267_s28 = sshll.u32 %s1574_s16, 8 }
  0x10   : > { %s2094_s25 = scalar_select %p1695_p11, 1, 0 }
  0x11   : > { %s2095_s26 = scalar_select %p1699_p12, 1, 0 }
  0x12   : > { %s1197_s29 = sshll.u32 %s312_s27, 4  ;;  %s1708_s12 = scalar_lea.hbm %s2079_s0, %s1267_s28 }
  0x13   : > { %s316_s18 = scalar_lea.vmem [#allocation2], %s1197_s29  ;;  %p1712_p13 = pnand %p1382_p10, %p1684_p5 }
  0x14   : > { %s323_s20 = sshll.u32 %s316_s18, 4  ;;  %s1718_s22 = scalar_lea.sflag [#allocation3], %s312_s27  ;;  %s1716_s20 = int_to_ptr.vmem [resolvable:$true] %s323_s20 }
  0x15   : > { %s1478_s30 = scalar_lea.hbm %s1708_s12, 256  ;;  %p1480_p1 = pneg %p1712_p13 }
  0x16   : > { %p1479_p0 = scmp.ne.s32.totalorder %s1708_s12, %s1478_s30  ;;  %s1483_s29 = scalar_lea.hbm %s2079_s0, 512 }
  0x17   : > { %p1484_p4 = scmp.lt.u32.totalorder %s1708_s12, %s2079_s0  ;;  %p1485_p5 = scmp.lt.u32.totalorder %s1483_s29, %s1478_s30 }
  0x18   : > { %p1481_p2 = pnand %p1480_p1, %p1479_p0  ;;  %p1487_p8 = scmp.lt.u32.totalorder %s1478_s30, %s1708_s12 }
  0x19   : > { %p1486_p7 = por %p1485_p5, %p1484_p4 }
  0x1a   : > { %p1482_p3 = pneg %p1481_p2 }
  0x1b   : > { %p1488_p10 = por %p1487_p8, %p1486_p7 }
  0x1d   : > { %p1489_p9 = pnand %p1488_p10, %p1482_p3 }
  0x1f   : > { %1492 = shalt.err (!%p1489_p9)
}
  0x20   : > { %s1493_s27 = scalar_lea.vmem %s1716_s20, 256  ;;  %s1576_s28 = smov [#allocation2]  }
  0x21   : > { %p1494_p0 = scmp.ne.s32.totalorder %s1716_s20, %s1493_s27  ;;  %s1498_s23 = sshll.u32 %s1576_s28, 4  ;;  %s1499_s23 = int_to_ptr.vmem [resolvable:$false] %s1498_s23 }
  0x22   : > { %s1500_s11 = scalar_lea.vmem %s1499_s23, 512  ;;  %p1501_p11 = scmp.lt.s32.totalorder %s1716_s20, %s1499_s23 }
  0x23   : > { %p1496_p2 = pnand %p1494_p0, %p1480_p1  ;;  %p1502_p4 = scmp.lt.s32.totalorder %s1500_s11, %s1493_s27 }
  0x25   : > { %p1497_p12 = pneg %p1496_p2  ;;  %p1503_p5 = por %p1502_p4, %p1501_p11 }
  0x27   : > { %p1504_p7 = pnand %p1503_p5, %p1497_p12 }
  0x29   : > { %1507 = shalt.err (!%p1504_p7)
}
  0x2a   : > { %s1577_s30 = smov 64   ;;  %s1578_s29 = smov 4  }
  0x2b   : > { %1377 = dma.hbm_to_vmem [thread:$0]  (!%p1712_p13), %s1708_s12, 256, %s1716_s20, %s1718_s22, %s1577_s30, %s1577_s30, %s1578_s29  }
  0x2c   : > { %p1200_p9 = scmp.ge.s32.totalorder %s1574_s16, 1  ;;  %p331_p1 = scmp.lt.s32.totalorder %s1574_s16, 3 }
  0x2e   : > { %p332_p3 = pnand %p1200_p9, %p331_p1 }
  0x2f   : > { %s1749_s18 = sand.u32 (!%p332_p3), 1, %s1566_s14  }
  0x30   : > { %335 = sbr.rel (%p332_p3) target bundleno = 5534 (0x159e), region = 60  ;;  %s1201_s27 = sshll.u32 (!%p332_p3), %s1749_s18, 4 }
  0x31   : > { %s338_s28 = scalar_lea.sflag (!%p332_p3), [#allocation3], %s1749_s18  ;;  %s341_s23 = scalar_lea.vmem (!%p332_p3), [#allocation2], %s1201_s27 }
  0x37   : > { %1553 = dma.done.wait (%p1688_p6), %s338_s28, 256  }
  0x38   : > { %1555 = vsyncadd (%p1688_p6), %s338_s28, 4294967040  ;;  %v1579_v0 = vmov 0.0   ;;  %vm1580_vm0 = vmmov 0   ;;  %v397_v1 = vld [vmem:[%s341_s23] sm:$0xf]  ;;  %vm414_vm1 = vcmask 1041408   ;;  %v379_v20 = vlaneseq }
  0x39   : > { %1298 = vmatprep.subr.bf16.mxu0 %v1579_v0  ;;  %1300 = vmatprep.mubr.msk.bf16.mxu0 %vm1580_vm0, %v1579_v0  ;;  %v1203_v2 = vld [vmem:[%s341_s23 + $0x4] sm:$0xf]  ;;  %v1204_v3 = vld [vmem:[%s341_s23 + $0x8] sm:$0xf]  ;;  %v1205_v5 = vld [vmem:[%s341_s23 + $0xc] sm:$0xf] }
  0x3a   : > { %1304 = vmatprep.subr.bf16.mxu1 %v1579_v0  ;;  %1314 = vmatprep.mubr.msk.bf16.mxu1 %vm1580_vm0, %v1579_v0  ;;  %v400_v4 = vadd.f32 %v1203_v2, %v397_v1  ;;  %v408_v11 = vld [vmem:[%s2080_s1] sm:$0xf]  ;;  %vm410_vm2 = vcmask 31744   ;;  %s1581_s12 = smov 64   ;;  %vm458_vm3 = vcmask 1048064   ;;  %s1582_s20 = smov 65  }
  0x3b   : > { %s1583_s21 = smov 127   ;;  %v1781_v21 = vand.u32 127, %v379_v20  ;;  %s1584_s11 = smov 72   ;;  %vm1586_vm10 = vmmov 1   ;;  %vm522_vm13 = vcmask 1043456   ;;  %vm518_vm14 = vcmask 588800  }
  0x3c   : > { %v403_v6 = vadd.f32 %v1204_v3, %v400_v4  ;;  %s1585_s30 = smov 120   ;;  %v512_v57 = vld [vmem:[%s2081_s2] sm:$0xf]  ;;  %vm672_vm15 = vcmask 523264   ;;  %s1587_s29 = smov 1  }
  0x3d   : > { %v385_v22 = vand.u32 7, %v1781_v21  ;;  %vm395_vm6 = vcmp.ge.s32.totalorder %v1781_v21, 8  ;;  %vm396_vm9 = vcmp.lt.s32.totalorder %v1781_v21, 56  ;;  %v945_v21 = vld [vmem:[%s2086_s7] sm:$0xf]  ;;  %s1264_s28 = sshll.u32 %s1666_s17, 7 }
  0x3e   : > { %v406_v7 = vadd.f32 %v1205_v5, %v403_v6  ;;  %vm1809_vm7 = vmpackc.low %vm395_vm6, %vm395_vm6  ;;  %p2109_p11 = scmp.ne.s32.totalorder %s2094_s25, 0  ;;  %s1589_s17 = smov [#allocation5]  }
  0x3f   : > { %vm1784_vm4 = vcmp.gt.s32.totalorder %v385_v22, 0  ;;  %vm1791_vm5 = vcmp.lt.s32.totalorder %v385_v22, 7  ;;  %vm1841_vm12 = vmpackc.low %vm396_vm9, %vm396_vm9  ;;  %s1512_s24 = sshll.u32 %s1589_s17, 4  ;;  %s1513_s24 = int_to_ptr.vmem [resolvable:$false] %s1512_s24 }
  0x40   : > { %v407_v8 = vmul.f32 0.25, %v406_v7  ;;  %vm1818_vm8 = vmpackc.low %vm1784_vm4, %vm395_vm6  ;;  %s1514_s27 = scalar_lea.vmem %s1513_s24, 256 }
  0x41   : > { %vm1828_vm11 = vmpackc.low %vm1791_vm5, %vm1586_vm10 }
  0x42   : > { %v409_v9 = vpack.c.bf16 %v407_v8, %v407_v8 }
  0x44   : > { %v416_v10 = vsel %vm414_vm1, %v409_v9, 0  ;;  %vm677_vm1 = vcmask 64512  }
  0x45   : > { %1299 = vmatpush3.bf16.msra.mxu0 %v416_v10 }
  0x46   : > { %1318 = vmatprep.subr.bf16.mxu0 %v1579_v0 }
  0x48   : > { %1301 = vmatmul.mubr.msk.bf16.vlgmr.msra.gmra.mrb[0].mxu0 %vm410_vm2, %v408_v11 }
  0x49   : > { %1328 = vmatprep.mubr.msk.bf16.mxu0 %vm1580_vm0, %v1579_v0 }
 0x11b   : > { %v1769_v12 = vpop.f32.mrb[0].mxu0 }
 0x11c   : > { %459 = vrot.lane.b32.xlu0 %v1769_v12, %s1581_s12  ;;  %v1302_v13 = vpop.f32.mrb[1].mxu0 }
 0x11d   : > { %v455_v14 = vpop.f32.mrb[2].mxu0 }
 0x11e   : > { %v1303_v15 = vpop.f32.mrb[3].mxu0 }
 0x18e   : > { %v460_v16 = vpop.permute.xlu0 %459 }
 0x18f   : > { %v461_v17 = vsel %vm458_vm3, %v460_v16, %v1769_v12 }
 0x190   : > { %462 = vrot.lane.b32.xlu0 %v461_v17, %s1581_s12 }
 0x202   : > { %v463_v18 = vpop.permute.xlu0 %462 }
 0x203   : > { %v464_v19 = vsel %vm458_vm3, %v463_v18, %v1769_v12 }
 0x204   : > { %466 = vrot.lane.b32.xlu1 %v464_v19, %s1582_s20 }
 0x208   : > { %470 = vrot.lane.b32.xlu1 %v464_v19, %s1583_s21 }
 0x276   : > { %v467_v24 = vpop.permute.xlu1 %466 }
 0x277   : > { %v469_v25 = vsel %vm1784_vm4, %v467_v24, 0.0 }
 0x278   : > { %474 = vrot.lane.b32.xlu0 %v469_v25, %s1581_s12 }
 0x27a   : > { %v471_v27 = vpop.permute.xlu1 %470 }
 0x27b   : > { %v473_v28 = vsel %vm1791_vm5, %v471_v27, 0.0  ;;  %v1214_v49 = vpack.c.bf16 %v471_v27, %v1769_v12 }
 0x27c   : > { %477 = vrot.lane.b32.xlu1 %v473_v28, %s1581_s12 }
 0x2ea   : > { %v475_v29 = vpop.permute.xlu0 %474 }
 0x2eb   : > { %v476_v30 = vsel %vm458_vm3, %v475_v29, %v469_v25 }
 0x2ec   : > { %480 = vrot.lane.b32.xlu0 %v476_v30, %s1581_s12 }
 0x2ee   : > { %v478_v31 = vpop.permute.xlu1 %477 }
 0x2ef   : > { %v479_v32 = vsel %vm458_vm3, %v478_v31, %v473_v28 }
 0x2f0   : > { %482 = vrot.lane.b32.xlu1 %v479_v32, %s1581_s12 }
 0x35e   : > { %v481_v33 = vpop.permute.xlu0 %480 }
 0x35f   : > { %v484_v34 = vsel %vm458_vm3, %v481_v33, %v469_v25 }
 0x360   : > { %v1428_v35 = vpack.i.bf16 %v464_v19, %v484_v34 }
 0x362   : > { %1429 = vrot.lane.b32.xlu0 %v1428_v35, %s1584_s11  ;;  %v483_v36 = vpop.permute.xlu1 %482 }
 0x363   : > { %v485_v37 = vsel %vm458_vm3, %v483_v36, %v473_v28 }
 0x364   : > { %492 = vrot.lane.b32.xlu1 %v485_v37, %s1584_s11 }
 0x366   : > { %1434 = vrot.lane.b32.xlu0 %v1428_v35, %s1585_s30 }
 0x368   : > { %504 = vrot.lane.b32.xlu1 %v485_v37, %s1585_s30  ;;  %v620_v37 = vld [vmem:[%s2082_s3] sm:$0xf] }
 0x3d4   : > { %v1430_v38 = vpop.permute.xlu0 %1429 }
 0x3d5   : > { %v1432_v39 = vunpack.i.h.bf16 %v1430_v38  ;;  %v1431_v40 = vunpack.i.l.bf16 %v1430_v38 }
 0x3d6   : > { %v493_v43 = vpop.permute.xlu1 %492 }
 0x3d7   : > { %v1208_v42 = vpack.c.bf16 %v1432_v39, %v1431_v40  ;;  %v1211_v45 = vpack.c.bf16 %v467_v24, %v493_v43 }
 0x3d8   : > { %v1435_v46 = vpop.permute.xlu0 %1434 }
 0x3d9   : > { %1305 = vmatpush3.bf16.msk.msra.mxu1 %vm1809_vm7, %v1208_v42  ;;  %v1437_v50 = vunpack.i.h.bf16 %v1435_v46  ;;  %v1436_v51 = vunpack.i.l.bf16 %v1435_v46 }
 0x3da   : > { %1306 = vmatprep.subr.bf16.mxu1 %v1579_v0  ;;  %v505_v47 = vpop.permute.xlu1 %504 }
 0x3db   : > { %v511_v52 = vsel %vm396_vm9, %v505_v47, 0.0  ;;  %v1217_v54 = vpack.c.bf16 %v1437_v50, %v1436_v51  ;;  %v1909_v47 = vshrl.u32 %v379_v20, 7  ;;  %v1588_v20 = vmov 0  }
 0x3dc   : > { %v517_v55 = vpack.c.bf16 %v511_v52, %v511_v52  ;;  %1448 = vset.pattern.permute.xlu1 %v1588_v20  ;;  %1469 = vset.pattern.permute.xlu0 %v1588_v20 }
 0x3dd   : > { %1307 = vmatpush3.bf16.msk.msra.mxu1 %vm1818_vm8, %v1211_v45  ;;  %v676_v45 = vld [vmem:[%s2083_s4] sm:$0x3] }
 0x3de   : > { %1308 = vmatprep.subr.bf16.mxu1 %v1579_v0  ;;  %v524_v56 = vsel %vm522_vm13, %v517_v55, 0  ;;  %v752_v55 = vld [vmem:[%s2084_s5] sm:$0xff] }
 0x3e1   : > { %1309 = vmatpush3.bf16.msk.msra.mxu1 %vm1828_vm11, %v1214_v49  ;;  %v761_v49 = vsub.s32 1, %v1909_v47 }
 0x3e2   : > { %1310 = vmatprep.subr.bf16.mxu1 %v1579_v0 }
 0x3e5   : > { %1311 = vmatpush3.bf16.msk.msra.mxu1 %vm1841_vm12, %v1217_v54 }
 0x3e6   : > { %1312 = vmatprep.subr.bf16.mxu1 %v1579_v0 }
 0x3e9   : > { %1313 = vmatpush3.bf16.msra.mxu1 %v524_v56 }
 0x3ea   : > { %1332 = vmatprep.subr.mxu1 %v1579_v0 }
 0x3ec   : > { %1315 = vmatmul.mubr.msk.bf16.vlgmr.msra.gmra.mrb[0].mxu1 %vm518_vm14, %v512_v57 }
 0x3ed   : > { %1334 = vmatprep.mubr.msk.f32.mxu1 %vm1580_vm0, %v1579_v0 }
 0x4bf   : > { %v560_v58 = vpop.f32.mrb[0].mxu1 }
 0x4c0   : > { %v566_v59 = vmax.f32 %v560_v58, 0.0  ;;  %v1316_v60 = vpop.f32.mrb[1].mxu1  ;;  %v755_v58 = vsub.s32 0, %v1909_v47 }
 0x4c1   : > { %v563_v61 = vpop.f32.mrb[2].mxu1 }
 0x4c2   : > { %567 = vrot.lane.b32.xlu0 %v566_v59, %s1581_s12  ;;  %v1317_v62 = vpop.f32.mrb[3].mxu1 }
 0x534   : > { %v568_v63 = vpop.permute.xlu0 %567 }
 0x535   : > { %v569_v1 = vsel %vm458_vm3, %v568_v63, %v566_v59 }
 0x536   : > { %570 = vrot.lane.b32.xlu1 %v569_v1, %s1581_s12 }
 0x5a8   : > { %v571_v2 = vpop.permute.xlu1 %570 }
 0x5a9   : > { %v572_v3 = vsel %vm458_vm3, %v571_v2, %v566_v59 }
 0x5aa   : > { %578 = vrot.lane.b32.xlu1 %v572_v3, %s1583_s21  ;;  %574 = vrot.lane.b32.xlu0 %v572_v3, %s1582_s20 }
 0x61c   : > { %v579_v4 = vpop.permute.xlu1 %578  ;;  %v575_v5 = vpop.permute.xlu0 %574 }
 0x61d   : > { %v581_v6 = vsel %vm1791_vm5, %v579_v4, 0.0  ;;  %v577_v7 = vsel %vm1784_vm4, %v575_v5, 0.0  ;;  %v1227_v30 = vpack.c.bf16 %v579_v4, %v566_v59 }
 0x61e   : > { %585 = vrot.lane.b32.xlu1 %v581_v6, %s1581_s12  ;;  %582 = vrot.lane.b32.xlu0 %v577_v7, %s1581_s12 }
 0x690   : > { %v586_v8 = vpop.permute.xlu1 %585  ;;  %v583_v9 = vpop.permute.xlu0 %582 }
 0x691   : > { %v587_v10 = vsel %vm458_vm3, %v586_v8, %v581_v6  ;;  %v584_v11 = vsel %vm458_vm3, %v583_v9, %v577_v7 }
 0x692   : > { %590 = vrot.lane.b32.xlu1 %v587_v10, %s1581_s12  ;;  %588 = vrot.lane.b32.xlu0 %v584_v11, %s1581_s12 }
 0x704   : > { %v591_v13 = vpop.permute.xlu1 %590  ;;  %v589_v14 = vpop.permute.xlu0 %588 }
 0x705   : > { %v592_v15 = vsel %vm458_vm3, %v589_v14, %v577_v7  ;;  %v593_v16 = vsel %vm458_vm3, %v591_v13, %v581_v6 }
 0x706   : > { %v1438_v17 = vpack.i.bf16 %v572_v3, %v592_v15  ;;  %600 = vrot.lane.b32.xlu1 %v593_v16, %s1584_s11 }
 0x708   : > { %1439 = vrot.lane.b32.xlu0 %v1438_v17, %s1584_s11 }
 0x70a   : > { %612 = vrot.lane.b32.xlu1 %v593_v16, %s1585_s30 }
 0x70c   : > { %1444 = vrot.lane.b32.xlu0 %v1438_v17, %s1585_s30 }
 0x778   : > { %v601_v25 = vpop.permute.xlu1 %600 }
 0x779   : > { %v1224_v27 = vpack.c.bf16 %v575_v5, %v601_v25 }
 0x77a   : > { %v1440_v18 = vpop.permute.xlu0 %1439 }
 0x77b   : > { %v1442_v19 = vunpack.i.h.bf16 %v1440_v18  ;;  %v1441_v22 = vunpack.i.l.bf16 %v1440_v18 }
 0x77c   : > { %v613_v29 = vpop.permute.xlu1 %612 }
 0x77d   : > { %v1221_v24 = vpack.c.bf16 %v1442_v19, %v1441_v22  ;;  %v619_v33 = vsel %vm396_vm9, %v613_v29, 0.0 }
 0x77e   : > { %v1445_v28 = vpop.permute.xlu0 %1444  ;;  %v625_v35 = vpack.c.bf16 %v619_v33, %v619_v33 }
 0x77f   : > { %1319 = vmatpush3.bf16.msk.msra.mxu0 %vm1809_vm7, %v1221_v24  ;;  %v1447_v31 = vunpack.i.h.bf16 %v1445_v28  ;;  %v1446_v32 = vunpack.i.l.bf16 %v1445_v28 }
 0x780   : > { %1320 = vmatprep.subr.bf16.mxu0 %v1579_v0  ;;  %v630_v36 = vsel %vm522_vm13, %v625_v35, 0 }
 0x781   : > { %v1230_v34 = vpack.c.bf16 %v1447_v31, %v1446_v32 }
 0x783   : > { %1321 = vmatpush3.bf16.msk.msra.mxu0 %vm1818_vm8, %v1224_v27 }
 0x784   : > { %1322 = vmatprep.subr.bf16.mxu0 %v1579_v0 }
 0x787   : > { %1323 = vmatpush3.bf16.msk.msra.mxu0 %vm1828_vm11, %v1227_v30 }
 0x788   : > { %1324 = vmatprep.subr.bf16.mxu0 %v1579_v0 }
 0x78b   : > { %1325 = vmatpush3.bf16.msk.msra.mxu0 %vm1841_vm12, %v1230_v34 }
 0x78c   : > { %1326 = vmatprep.subr.bf16.mxu0 %v1579_v0 }
 0x78f   : > { %1327 = vmatpush3.bf16.msra.mxu0 %v630_v36 }
 0x790   : > { %1337 = vmatprep.subr.bf16.mxu0 %v1579_v0 }
 0x792   : > { %1329 = vmatmul.mubr.msk.bf16.vlgmr.msra.gmra.mrb[4].mxu0 %vm518_vm14, %v620_v37 }
 0x793   : > { %1347 = vmatprep.mubr.msk.bf16.mxu0 %vm1580_vm0, %v1579_v0 }
 0x865   : > { %v666_v38 = vpop.f32.mrb[4].mxu0 }
 0x866   : > { %v1330_v39 = vpop.f32.mrb[5].mxu0  ;;  %v673_v40 = vsel %vm672_vm15, %v666_v38, 0.0 }
 0x867   : > { %674 = vadd.xlane.f32.xlu0 %v673_v40  ;;  %v669_v42 = vpop.f32.mrb[6].mxu0 }
 0x868   : > { %v1331_v43 = vpop.f32.mrb[7].mxu0 }
 0x8f4   : > { %v675_v46 = vpop.xlane.xlu0 %674 }
 0x8f5   : > { %1333 = vmatpush3.msra.mxu1 %v675_v46 }
 0x8f6   : > { %1335 = vmatmul.mubr.msk.f32.vlgmr.msra.gmra.mrb[4].mxu1 %vm677_vm1, %v676_v45  ;;  %1351 = vmatprep.subr.bf16.mxu1 %v1579_v0  ;;  %v839_v45 = vld [vmem:[%s2085_s6] sm:$0xf] }
 0x8f7   : > { %1361 = vmatprep.mubr.msk.bf16.mxu1 %vm1580_vm0, %v1579_v0 }
 0x9c9   : > { %v747_v50 = vpop.f32.mrb[4].mxu1 }
 0x9ca   : > { %v751_v51 = vmax.f32 %v747_v50, 0.0  ;;  %v1336_v52 = vpop.f32.mrb[5].mxu1 }
 0x9cc   : > { %v762_v54 = vrot.slane %v751_v51, %v761_v49  ;;  %v756_v59 = vrot.slane %v751_v51, %v755_v58 }
 0x9ce   : > { %764 = vrot.lane.b32.xlu1 %v762_v54, %s1587_s29  ;;  %v757_v60 = vmul.f32 %v756_v59, %v752_v55 }
 0xa40   : > { %v765_v56 = vpop.permute.xlu1 %764 }
 0xa41   : > { %v767_v57 = vmul.f32 %v765_v56, %v752_v55 }
 0xa43   : > { %769 = vrot.lane.b32.xlu1 %v767_v57, %s1583_s21 }
 0xab5   : > { %v770_v61 = vpop.permute.xlu1 %769 }
 0xab6   : > { %v772_v62 = vadd.f32 %v770_v61, %v757_v60 }
 0xab8   : > { %v1234_v63 = vmul.f32 -1.442695, %v772_v62 }
 0xaba   : > { %1470 = vpow2.f32 %v1234_v63 }
 0xac4   : > { %v1471_v1 = vpop.eup %1470 }
 0xac5   : > { %v776_v2 = vadd.f32 1.0, %v1471_v1 }
 0xac7   : > { %1472 = vrcp.f32 %v776_v2 }
 0xad1   : > { %v1473_v3 = vpop.eup %1472 }
 0xad2   : > { %781 = vperm.xlu1 %1448, %v1473_v3  }
 0xb51   : > { %v782_v4 = vpop.permute.xlu1 %781 }
 0xb52   : > { %v784_v5 = vmul.f32 %v782_v4, %v666_v38 }
 0xb54   : > { %v1923_v6 = vadd.f32 %v784_v5, %v1769_v12 }
 0xb56   : > { %786 = vrot.lane.b32.xlu1 %v1923_v6, %s1581_s12 }
 0xbc8   : > { %v787_v7 = vpop.permute.xlu1 %786 }
 0xbc9   : > { %v788_v8 = vsel %vm458_vm3, %v787_v7, %v1923_v6 }
 0xbca   : > { %789 = vrot.lane.b32.xlu1 %v788_v8, %s1581_s12 }
 0xc3c   : > { %v790_v9 = vpop.permute.xlu1 %789 }
 0xc3d   : > { %v791_v10 = vsel %vm458_vm3, %v790_v9, %v1923_v6 }
 0xc3e   : > { %793 = vrot.lane.b32.xlu1 %v791_v10, %s1582_s20 }
 0xc42   : > { %797 = vrot.lane.b32.xlu1 %v791_v10, %s1583_s21 }
 0xcb0   : > { %v794_v11 = vpop.permute.xlu1 %793 }
 0xcb1   : > { %v796_v12 = vsel %vm1784_vm4, %v794_v11, 0.0 }
 0xcb2   : > { %801 = vrot.lane.b32.xlu1 %v796_v12, %s1581_s12 }
 0xcb4   : > { %v798_v13 = vpop.permute.xlu1 %797 }
 0xcb5   : > { %v800_v14 = vsel %vm1791_vm5, %v798_v13, 0.0  ;;  %v1242_v35 = vpack.c.bf16 %v798_v13, %v1923_v6 }
 0xcb6   : > { %804 = vrot.lane.b32.xlu0 %v800_v14, %s1581_s12 }
 0xd24   : > { %v802_v15 = vpop.permute.xlu1 %801 }
 0xd25   : > { %v803_v16 = vsel %vm458_vm3, %v802_v15, %v796_v12 }
 0xd26   : > { %807 = vrot.lane.b32.xlu1 %v803_v16, %s1581_s12 }
 0xd28   : > { %v805_v17 = vpop.permute.xlu0 %804 }
 0xd29   : > { %v806_v18 = vsel %vm458_vm3, %v805_v17, %v800_v14 }
 0xd2a   : > { %809 = vrot.lane.b32.xlu1 %v806_v18, %s1581_s12 }
 0xd98   : > { %v808_v19 = vpop.permute.xlu1 %807 }
 0xd99   : > { %v811_v22 = vsel %vm458_vm3, %v808_v19, %v796_v12 }
 0xd9a   : > { %v1449_v24 = vpack.i.bf16 %v791_v10, %v811_v22 }
 0xd9c   : > { %1450 = vrot.lane.b32.xlu1 %v1449_v24, %s1584_s11  ;;  %v810_v25 = vpop.permute.xlu1 %809 }
 0xd9d   : > { %v812_v27 = vsel %vm458_vm3, %v810_v25, %v800_v14 }
 0xda0   : > { %819 = vrot.lane.b32.xlu1 %v812_v27, %s1584_s11 }
 0xda4   : > { %1455 = vrot.lane.b32.xlu1 %v1449_v24, %s1585_s30 }
 0xda8   : > { %831 = vrot.lane.b32.xlu1 %v812_v27, %s1585_s30 }
 0xe0e   : > { %v1451_v28 = vpop.permute.xlu1 %1450 }
 0xe0f   : > { %v1453_v29 = vunpack.i.h.bf16 %v1451_v28  ;;  %v1452_v30 = vunpack.i.l.bf16 %v1451_v28 }
 0xe11   : > { %v1236_v31 = vpack.c.bf16 %v1453_v29, %v1452_v30 }
 0xe12   : > { %v820_v32 = vpop.permute.xlu1 %819 }
 0xe13   : > { %1338 = vmatpush3.bf16.msk.msra.mxu0 %vm1809_vm7, %v1236_v31  ;;  %v1239_v33 = vpack.c.bf16 %v794_v11, %v820_v32 }
 0xe14   : > { %1339 = vmatprep.subr.bf16.mxu0 %v1579_v0 }
 0xe16   : > { %v1456_v34 = vpop.permute.xlu1 %1455 }
 0xe17   : > { %1340 = vmatpush3.bf16.msk.msra.mxu0 %vm1818_vm8, %v1239_v33  ;;  %v1458_v36 = vunpack.i.h.bf16 %v1456_v34  ;;  %v1457_v37 = vunpack.i.l.bf16 %v1456_v34  ;;  %v1075_v33 = vld [vmem:[%s2088_s9] sm:$0xff] }
 0xe18   : > { %1341 = vmatprep.subr.bf16.mxu0 %v1579_v0 }
 0xe19   : > { %v1245_v40 = vpack.c.bf16 %v1458_v36, %v1457_v37 }
 0xe1a   : > { %v832_v38 = vpop.permute.xlu1 %831 }
 0xe1b   : > { %v838_v39 = vsel %vm396_vm9, %v832_v38, 0.0  ;;  %1342 = vmatpush3.bf16.msk.msra.mxu0 %vm1828_vm11, %v1242_v35 }
 0xe1c   : > { %1343 = vmatprep.subr.bf16.mxu0 %v1579_v0  ;;  %v844_v42 = vpack.c.bf16 %v838_v39, %v838_v39 }
 0xe1e   : > { %v849_v43 = vsel %vm522_vm13, %v844_v42, 0 }
 0xe1f   : > { %1344 = vmatpush3.bf16.msk.msra.mxu0 %vm1841_vm12, %v1245_v40 }
 0xe20   : > { %1345 = vmatprep.subr.bf16.mxu0 %v1579_v0 }
 0xe23   : > { %1346 = vmatpush3.bf16.msra.mxu0 %v849_v43 }
 0xe24   : > { %1365 = vmatprep.subr.mxu0 %v1579_v0 }
 0xe26   : > { %1348 = vmatmul.mubr.msk.bf16.vlgmr.msra.gmra.mrb[8].mxu0 %vm518_vm14, %v839_v45 }
 0xe27   : > { %1367 = vmatprep.mubr.msk.f32.mxu0 %vm1580_vm0, %v1579_v0 }
 0xef9   : > { %v885_v46 = vpop.f32.mrb[8].mxu0 }
 0xefa   : > { %v891_v50 = vmax.f32 %v885_v46, 0.0  ;;  %v1349_v51 = vpop.f32.mrb[9].mxu0 }
 0xefb   : > { %v888_v52 = vpop.f32.mrb[10].mxu0 }
 0xefc   : > { %892 = vrot.lane.b32.xlu0 %v891_v50, %s1581_s12  ;;  %v1350_v54 = vpop.f32.mrb[11].mxu0 }
 0xf6e   : > { %v893_v55 = vpop.permute.xlu0 %892 }
 0xf6f   : > { %v894_v56 = vsel %vm458_vm3, %v893_v55, %v891_v50 }
 0xf70   : > { %895 = vrot.lane.b32.xlu1 %v894_v56, %s1581_s12 }
 0xfe2   : > { %v896_v57 = vpop.permute.xlu1 %895 }
 0xfe3   : > { %v897_v20 = vsel %vm458_vm3, %v896_v57, %v891_v50 }
 0xfe4   : > { %903 = vrot.lane.b32.xlu1 %v897_v20, %s1583_s21  ;;  %899 = vrot.lane.b32.xlu0 %v897_v20, %s1582_s20  ;;  %s2034_s20 = scalar_lea.hbm %s2089_s10, %s1264_s28 }
0x1056   : > { %v904_v59 = vpop.permute.xlu1 %903  ;;  %v900_v60 = vpop.permute.xlu0 %899 }
0x1057   : > { %v906_v61 = vsel %vm1791_vm5, %v904_v59, 0.0  ;;  %v902_v62 = vsel %vm1784_vm4, %v900_v60, 0.0  ;;  %v1255_v16 = vpack.c.bf16 %v904_v59, %v891_v50 }
0x1058   : > { %910 = vrot.lane.b32.xlu1 %v906_v61, %s1581_s12  ;;  %907 = vrot.lane.b32.xlu0 %v902_v62, %s1581_s12 }
0x10ca   : > { %v911_v63 = vpop.permute.xlu1 %910  ;;  %v908_v1 = vpop.permute.xlu0 %907 }
0x10cb   : > { %v912_v2 = vsel %vm458_vm3, %v911_v63, %v906_v61  ;;  %v909_v3 = vsel %vm458_vm3, %v908_v1, %v902_v62 }
0x10cc   : > { %915 = vrot.lane.b32.xlu1 %v912_v2, %s1581_s12  ;;  %913 = vrot.lane.b32.xlu0 %v909_v3, %s1581_s12 }
0x113e   : > { %v916_v4 = vpop.permute.xlu1 %915  ;;  %v914_v26 = vpop.permute.xlu0 %913 }
0x113f   : > { %v917_v5 = vsel %vm458_vm3, %v914_v26, %v902_v62  ;;  %v918_v23 = vsel %vm458_vm3, %v916_v4, %v906_v61 }
0x1140   : > { %v1459_v7 = vpack.i.bf16 %v897_v20, %v917_v5  ;;  %925 = vrot.lane.b32.xlu1 %v918_v23, %s1584_s11 }
0x1142   : > { %1460 = vrot.lane.b32.xlu0 %v1459_v7, %s1584_s11  ;;  %s1111_s11 = scalar_lea.sflag [#allocation4], %s1749_s18 }
0x1144   : > { %937 = vrot.lane.b32.xlu1 %v918_v23, %s1585_s30 }
0x1146   : > { %1465 = vrot.lane.b32.xlu0 %v1459_v7, %s1585_s30 }
0x11b2   : > { %v926_v12 = vpop.permute.xlu1 %925 }
0x11b3   : > { %v1252_v13 = vpack.c.bf16 %v900_v60, %v926_v12 }
0x11b4   : > { %v1461_v8 = vpop.permute.xlu0 %1460 }
0x11b5   : > { %v1463_v9 = vunpack.i.h.bf16 %v1461_v8  ;;  %v1462_v10 = vunpack.i.l.bf16 %v1461_v8 }
0x11b6   : > { %v938_v15 = vpop.permute.xlu1 %937 }
0x11b7   : > { %v1249_v11 = vpack.c.bf16 %v1463_v9, %v1462_v10  ;;  %v944_v19 = vsel %vm396_vm9, %v938_v15, 0.0 }
0x11b8   : > { %v1466_v14 = vpop.permute.xlu0 %1465  ;;  %v950_v22 = vpack.c.bf16 %v944_v19, %v944_v19 }
0x11b9   : > { %1352 = vmatpush3.bf16.msk.msra.mxu1 %vm1809_vm7, %v1249_v11  ;;  %v1468_v17 = vunpack.i.h.bf16 %v1466_v14  ;;  %v1467_v18 = vunpack.i.l.bf16 %v1466_v14 }
0x11ba   : > { %1353 = vmatprep.subr.bf16.mxu1 %v1579_v0  ;;  %v955_v44 = vsel %vm522_vm13, %v950_v22, 0 }
0x11bb   : > { %v1258_v41 = vpack.c.bf16 %v1468_v17, %v1467_v18 }
0x11bd   : > { %1354 = vmatpush3.bf16.msk.msra.mxu1 %vm1818_vm8, %v1252_v13 }
0x11be   : > { %1355 = vmatprep.subr.bf16.mxu1 %v1579_v0 }
0x11c1   : > { %1356 = vmatpush3.bf16.msk.msra.mxu1 %vm1828_vm11, %v1255_v16 }
0x11c2   : > { %1357 = vmatprep.subr.bf16.mxu1 %v1579_v0 }
0x11c5   : > { %1358 = vmatpush3.bf16.msk.msra.mxu1 %vm1841_vm12, %v1258_v41 }
0x11c6   : > { %1359 = vmatprep.subr.bf16.mxu1 %v1579_v0  ;;  %v1000_v0 = vld [vmem:[%s2087_s8] sm:$0x3] }
0x11c9   : > { %1360 = vmatpush3.bf16.msra.mxu1 %v955_v44 }
0x11cc   : > { %1362 = vmatmul.mubr.msk.bf16.vlgmr.msra.gmra.mrb[8].mxu1 %vm518_vm14, %v945_v21 }
0x129f   : > { %v991_v48 = vpop.f32.mrb[8].mxu1 }
0x12a0   : > { %v1363_v24 = vpop.f32.mrb[9].mxu1  ;;  %v997_v25 = vsel %vm672_vm15, %v991_v48, 0.0 }
0x12a1   : > { %998 = vadd.xlane.f32.xlu0 %v997_v25  ;;  %v994_v27 = vpop.f32.mrb[10].mxu1 }
0x12a2   : > { %v1364_v28 = vpop.f32.mrb[11].mxu1 }
0x132e   : > { %v999_v53 = vpop.xlane.xlu0 %998 }
0x132f   : > { %1366 = vmatpush3.msra.mxu0 %v999_v53 }
0x1330   : > { %1368 = vmatmul.mubr.msk.f32.vlgmr.msra.gmra.mrb[12].mxu0 %vm677_vm1, %v1000_v0 }
0x1403   : > { %v1070_v29 = vpop.f32.mrb[12].mxu0 }
0x1404   : > { %v1074_v30 = vmax.f32 %v1070_v29, 0.0  ;;  %v1369_v31 = vpop.f32.mrb[13].mxu0 }
0x1406   : > { %v1085_v32 = vrot.slane %v1074_v30, %v761_v49  ;;  %v1079_v36 = vrot.slane %v1074_v30, %v755_v58 }
0x1408   : > { %1087 = vrot.lane.b32.xlu1 %v1085_v32, %s1587_s29  ;;  %v1080_v37 = vmul.f32 %v1079_v36, %v1075_v33  ;;  %s1202_s29 = sshll.u32 %s1749_s18, 3 }
0x1409   : > { %s377_s23 = scalar_lea.vmem [#allocation5], %s1202_s29 }
0x147a   : > { %v1088_v34 = vpop.permute.xlu1 %1087 }
0x147b   : > { %v1090_v35 = vmul.f32 %v1088_v34, %v1075_v33 }
0x147d   : > { %1092 = vrot.lane.b32.xlu1 %v1090_v35, %s1583_s21  ;;  %s1124_s21 = sshll.u32 %s377_s23, 4  ;;  %s2036_s21 = int_to_ptr.vmem [resolvable:$true] %s1124_s21 }
0x147e   : > { %s1508_s30 = scalar_lea.vmem %s2036_s21, 128  ;;  %p1515_p8 = scmp.lt.s32.totalorder %s2036_s21, %s1513_s24 }
0x147f   : > { %p1509_p6 = scmp.ne.s32.totalorder %s2036_s21, %s1508_s30  ;;  %p1516_p10 = scmp.lt.s32.totalorder %s1514_s27, %s1508_s30 }
0x1481   : > { %p1510_p12 = pnand %p1509_p6, %p2109_p11  ;;  %p1517_p0 = por %p1516_p10, %p1515_p8 }
0x1483   : > { %p1511_p13 = pneg %p1510_p12 }
0x1485   : > { %p1518_p2 = pnand %p1517_p0, %p1511_p13 }
0x14ef   : > { %v1093_v38 = vpop.permute.xlu1 %1092 }
0x14f0   : > { %v1095_v39 = vadd.f32 %v1093_v38, %v1080_v37 }
0x14f2   : > { %v1262_v40 = vmul.f32 -1.442695, %v1095_v39 }
0x14f4   : > { %1474 = vpow2.f32 %v1262_v40 }
0x14fe   : > { %v1475_v49 = vpop.eup %1474 }
0x14ff   : > { %v1099_v42 = vadd.f32 1.0, %v1475_v49 }
0x1501   : > { %1476 = vrcp.f32 %v1099_v42 }
0x150b   : > { %v1477_v43 = vpop.eup %1476 }
0x150c   : > { %1104 = vperm.xlu1 %1448, %v1477_v43  }
0x158b   : > { %v1105_v45 = vpop.permute.xlu1 %1104 }
0x158c   : > { %v1107_v46 = vmul.f32 %v1105_v45, %v991_v48 }
0x158e   : > { %v1108_v47 = vadd.f32 %v1107_v46, %v1923_v6 }
0x1590   : > { %1109 = vst.msk [vmem:[%s377_s23] sm:$0xff] %vm672_vm15, %v1108_v47 }
0x1591   : > { %1521 = shalt.err (!%p1518_p2)
}
0x1592   : > { %s1522_s18 = scalar_lea.hbm %s2034_s20, 128  ;;  %s1526_s23 = scalar_lea.hbm %s2089_s10, 256 }
0x1593   : > { %p1523_p4 = scmp.ne.s32.totalorder %s2034_s20, %s1522_s18  ;;  %p1527_p9 = scmp.lt.u32.totalorder %s2034_s20, %s2089_s10 }
0x1594   : > { %p1528_p1 = scmp.lt.u32.totalorder %s1526_s23, %s1522_s18  ;;  %p1530_p6 = scmp.lt.u32.totalorder %s1522_s18, %s2034_s20 }
0x1595   : > { %p1524_p5 = pnand %p1523_p4, %p2109_p11 }
0x1596   : > { %p1529_p3 = por %p1528_p1, %p1527_p9 }
0x1597   : > { %p1525_p7 = pneg %p1524_p5 }
0x1598   : > { %p1531_p12 = por %p1530_p6, %p1529_p3 }
0x159a   : > { %p1532_p13 = pnand %p1531_p12, %p1525_p7 }
0x159c   : > { %1535 = shalt.err (!%p1532_p13)
}
0x159d   : > { %1372 = dma.vmem_to_hbm [thread:$0]  (%p2109_p11), %s2036_s21, 128, %s2034_s20, %s1111_s11  }
0x159e PF: > { %s1136_s30 = sand.u32 1, %s1562_s13   ;;  %p2110_p8 = scmp.ne.s32.totalorder %s2095_s26, 0 }
0x159f   : > { %p2111_p10 = scmp.ge.s32.totalorder %s1574_s16, 2  ;;  %s1137_s17 = scalar_lea.sflag [#allocation4], %s1136_s30 }
0x15a1   : > { %p1379_p0 = pnand %p2111_p10, %p2110_p8 }
0x15a3   : > { %1557 = dma.done.wait (!%p1379_p0), %s1137_s17, 128  }
0x15a4   : > { %1559 = vsyncadd (!%p1379_p0), %s1137_s17, 4294967168  ;;  %s2112_s24 = sld [smem:[#allocation8_spill]]  ;;  %p23_p2 = scmp.ge.s32.totalorder %s1670_s19, 4  }
0x15a5   : > { %s2113_s13 = smov %s1566_s14  ;;  %s2114_s14 = smov %s1570_s15 }
0x15a6   : > { %s2116_s16 = smov %s1670_s19  ;;  %25 = sbr.rel (!%p23_p2) target bundleno = 5 (0x5), region = 108 }
0x15aa   : > { %s2115_s15 = smov %s2112_s24 }
0x15ad   :  { %1142 = vsyncpa [#allocation3], 1 }
0x15ae   :  { %1144 = vsyncpa [#allocation3 + $0x1], 1 }
0x15af   :  { %1145 = vsyncpa [#allocation4], 1 }
0x15b0   :  { %1147 = vsyncpa [#allocation4 + $0x1], 1 }

</bundles_post_ra>
